<compile_context>
chip_gen: v7x
topology: tpu7x:2x2x1
jax: 0.10.0
libtpu: 0.0.40
codegen_flags: <defaults>
</compile_context>

<pallas_src>
import math

import numpy as np
import jax
import jax.numpy as jnp
from jax import lax
from jax.experimental import pallas as pl
from jax.experimental.pallas import tpu as pltpu

# ----------------------------- config (small synthetic shapes) -----------------------
B, C, H, W = 2, 3, 16, 16
HW = H * W                         # 256  (lane-dense working width)
EMBED_DIM = 32
INPUT_IMAGE_SIZE = (H, W)
MASK_IN_CHANS = 16
C1 = MASK_IN_CHANS // 4            # 4   channels after conv1
C2 = MASK_IN_CHANS                 # 16  channels after conv2
LN_EPS = 1e-6
S1H, S1W = H // 2, W // 2          # 8x8 spatial after conv1
S2H, S2W = H // 4, W // 4          # 4x4 spatial after conv2 / conv3
S1 = S1H * S1W                     # 64
S2 = S2H * S2W                     # 16
N1 = S1 * C1                       # 256: conv1 output vec (pos1-major, channel-minor)
N2 = S2 * C2                       # 256: conv2 output vec (pos2-major, channel-minor)
N3 = EMBED_DIM * S2                # 512: conv3 output vec (embed-major) == flat NCHW
SPARSE_W = 2 * EMBED_DIM           # 64
PAD_W = 128 - SPARSE_W             # pad sparse to a full 128-lane slab
OUT_W = 128 + N3                   # 640 = 5*128, single lane-dense output


def _gelu_exact(x):
    # PyTorch nn.GELU() default = exact (erf) formulation.
    return 0.5 * x * (1.0 + lax.erf(x / jnp.sqrt(2.0).astype(x.dtype)))


def _group_sum_lanes(x, group):
    """Cyclic all-reduce (sum) within contiguous lane groups of size `group` (power of
    two, group-aligned) along the last axis.  Uses XLU rolls + VPU selects/adds only --
    no MXU weight push and no averaging-matrix DMA.  Within-group sources never cross a
    group boundary, so the full-width cyclic rolls are contamination-free."""
    n = x.shape[-1]
    lane = lax.broadcasted_iota(jnp.int32, x.shape, x.ndim - 1) % group
    s = x
    shift = 1
    while shift < group:
        fwd = pltpu.roll(s, shift, 1)                 # s[L - shift]
        bwd = pltpu.roll(s, (shift - group) % n, 1)   # s[L + group - shift]
        s = s + jnp.where(lane >= shift, fwd, bwd)
        shift *= 2
    return s


def _group_layernorm(y, group, w_t, b_t):
    # LayerNorm over contiguous channel groups of a flat (pos-major, channel-minor)
    # vector; biased variance (matches LayerNorm2d); rsqrt -> EUP.
    inv = 1.0 / group
    mu = _group_sum_lanes(y, group) * inv
    d = y - mu
    var = _group_sum_lanes(d * d, group) * inv
    return d * lax.rsqrt(var + LN_EPS) * w_t + b_t


# ----------------------------- fused SPG kernel ---------------------------------------
def spg_fused_kernel(img_ref, mir_ref, mats_ref, prm_ref, out_ref):
    E = EMBED_DIM
    img = img_ref[...]                                    # (B, C, HW) lane-dense
    mir = mir_ref[...]
    diff = jnp.mean(jnp.abs(img - mir), axis=1)           # (B, HW)

    # threshold = mean + unbiased std (torch .std default) over spatial dims
    mean_d = jnp.mean(diff, axis=1, keepdims=True)        # (B, 1)
    cen = diff - mean_d
    var = jnp.sum(cen * cen, axis=1, keepdims=True) * (1.0 / (HW - 1))
    thresh = mean_d + jnp.sqrt(var)
    mask = (diff > thresh).astype(jnp.float32)            # (B, HW) binary mask (stays in VMEM)

    # centroid of the mask (replaces the per-batch torch.nonzero loop); fallback = center
    pix = lax.broadcasted_iota(jnp.int32, (B, HW), 1).astype(jnp.float32)
    rows_f = jnp.floor(pix * (1.0 / W))
    cols_f = pix - rows_f * W
    count = jnp.sum(mask, axis=1, keepdims=True)
    denom = jnp.maximum(count, 1.0)
    cy = jnp.where(count > 0.5, jnp.sum(mask * rows_f, axis=1, keepdims=True) / denom, H / 2.0)
    cx = jnp.where(count > 0.5, jnp.sum(mask * cols_f, axis=1, keepdims=True) / denom, W / 2.0)

    # sparse embeddings: PromptEncoder._embed_points for one label==1 point + one padding point
    tx = 2.0 * ((cx + 0.5) / float(INPUT_IMAGE_SIZE[1])) - 1.0
    ty = 2.0 * ((cy + 0.5) / float(INPUT_IMAGE_SIZE[0])) - 1.0
    gx = prm_ref[7:8, 0:E // 2]                           # (1, E/2) gaussian PE rows
    gy = prm_ref[7:8, E // 2:E]
    proj = (2.0 * math.pi) * (tx * gx + ty * gy)          # (B, E/2)
    pe = jnp.concatenate([jnp.sin(proj), jnp.cos(proj)], axis=-1)   # (B, E)
    row0 = pe + prm_ref[7:8, E:2 * E]                     # label == 1 -> + point_embed[1]
    row1 = jnp.broadcast_to(prm_ref[7:8, 2 * E:3 * E], pe.shape)    # padding -> not_a_point
    sparse = jnp.concatenate([row0, row1], axis=-1)       # (B, 2E)

    # mask_downscaling: conv(2x2,s2)->LN->GELU->conv(2x2,s2)->LN->GELU->conv(1x1)
    # each conv (with its im2col) is a folded 256-wide matmul; LNs use XLU roll butterflies.
    y1 = jnp.dot(mask, mats_ref[0], preferred_element_type=jnp.float32) + prm_ref[0:1, 0:N1]
    a1 = _gelu_exact(_group_layernorm(y1, C1, prm_ref[1:2, 0:N1], prm_ref[2:3, 0:N1]))
    y2 = jnp.dot(a1, mats_ref[1], preferred_element_type=jnp.float32) + prm_ref[3:4, 0:N2]
    a2 = _gelu_exact(_group_layernorm(y2, C2, prm_ref[4:5, 0:N2], prm_ref[5:6, 0:N2]))
    d_lo = jnp.dot(a2, mats_ref[2], preferred_element_type=jnp.float32)
    d_hi = jnp.dot(a2, mats_ref[3], preferred_element_type=jnp.float32)
    dense = jnp.concatenate([d_lo, d_hi], axis=-1) + prm_ref[6:7, :]      # (B, N3)

    # single lane-dense output: [sparse | zero pad to 128 | dense] -> one unmasked store
    pad = jnp.zeros((B, PAD_W), jnp.float32)
    out_ref[...] = jnp.concatenate([sparse, pad, dense], axis=-1)


def spg_fused_call(img2, mir2, mats, prm):
    # Gridless call: one invocation, whole operands resident in VMEM, no pipeline
    # double-buffering for a 1-step grid.  (~1 MiB of weights, well under VMEM.)
    return pl.pallas_call(
        spg_fused_kernel,
        out_shape=jax.ShapeDtypeStruct((B, OUT_W), jnp.float32),
    )(img2, mir2, mats, prm)


# ----------------------------- deterministic parameter init --------------------------
def init_params(key):
    E = EMBED_DIM
    ks = jax.random.split(key, 13)
    p = {}
    p["pe_gaussian"] = jax.random.normal(ks[0], (2, E // 2), jnp.float32)     # PositionEmbeddingRandom
    p["point_embed"] = jax.random.normal(ks[1], (4, E), jnp.float32)          # only index 1 used (label==1)
    p["not_a_point"] = jax.random.normal(ks[2], (1, E), jnp.float32)
    p["w1"] = jax.random.normal(ks[3], (C1, 1, 2, 2), jnp.float32) * 0.5
    p["b1"] = jax.random.normal(ks[4], (C1,), jnp.float32) * 0.1
    p["ln1_w"] = 1.0 + 0.1 * jax.random.normal(ks[5], (C1,), jnp.float32)
    p["ln1_b"] = 0.1 * jax.random.normal(ks[6], (C1,), jnp.float32)
    p["w2"] = jax.random.normal(ks[7], (C2, C1, 2, 2), jnp.float32) * 0.3
    p["b2"] = jax.random.normal(ks[8], (C2,), jnp.float32) * 0.1
    p["ln2_w"] = 1.0 + 0.1 * jax.random.normal(ks[9], (C2,), jnp.float32)
    p["ln2_b"] = 0.1 * jax.random.normal(ks[10], (C2,), jnp.float32)
    p["w3"] = jax.random.normal(ks[11], (EMBED_DIM, C2, 1, 1), jnp.float32) * 0.3
    p["b3"] = jax.random.normal(ks[12], (EMBED_DIM,), jnp.float32) * 0.1
    return p


def pack_params(p):
    """One-time host-side repacking: fold conv im2col into dense matmul weights
    (mats = [M1, M2, M3_lo, M3_hi], one DMA) and pack every small bias/LN/PE parameter
    into one (8, 512) array (one DMA)."""
    E = EMBED_DIM
    w1 = np.asarray(p["w1"]); b1 = np.asarray(p["b1"])
    ln1w = np.asarray(p["ln1_w"]); ln1b = np.asarray(p["ln1_b"])
    w2 = np.asarray(p["w2"]); b2 = np.asarray(p["b2"])
    ln2w = np.asarray(p["ln2_w"]); ln2b = np.asarray(p["ln2_b"])
    w3 = np.asarray(p["w3"]); b3 = np.asarray(p["b3"])

    # conv1 (1->C1, 2x2, stride 2) on the flat H*W mask -> (pos1-major, channel-minor) N1-vec
    M1 = np.zeros((HW, N1), np.float32)
    for i in range(S1H):
        for j in range(S1W):
            pos1 = i * S1W + j
            for a in range(2):
                for bb in range(2):
                    src = (2 * i + a) * W + (2 * j + bb)
                    M1[src, pos1 * C1:(pos1 + 1) * C1] = w1[:, 0, a, bb]

    # conv2 (C1->C2, 2x2, stride 2) on the N1-vec -> (pos2-major, channel-minor) N2-vec
    M2 = np.zeros((N1, N2), np.float32)
    for pp in range(S2H):
        for q in range(S2W):
            pos2 = pp * S2W + q
            for a in range(2):
                for bb in range(2):
                    pos1 = (2 * pp + a) * S1W + (2 * q + bb)
                    for c1 in range(C1):
                        M2[pos1 * C1 + c1, pos2 * C2:(pos2 + 1) * C2] = w2[:, c1, a, bb]

    # conv3 (1x1, C2->E) -> (embed-major, pos2-minor) N3-vec == flat NCHW dense embedding
    M3 = np.zeros((N2, N3), np.float32)
    for pos2 in range(S2):
        for c2 in range(C2):
            M3[pos2 * C2 + c2, np.arange(E) * S2 + pos2] = w3[:, c2, 0, 0]

    mats = np.stack([M1, M2, M3[:, :N1], M3[:, N1:]], 0).astype(np.float32)   # (4,256,256)

    prm = np.zeros((8, N3), np.float32)
    prm[0, :N1] = np.tile(b1, S1)
    prm[1, :N1] = np.tile(ln1w, S1)
    prm[2, :N1] = np.tile(ln1b, S1)
    prm[3, :N2] = np.tile(b2, S2)
    prm[4, :N2] = np.tile(ln2w, S2)
    prm[5, :N2] = np.tile(ln2b, S2)
    prm[6, :] = np.repeat(b3, S2)                                  # embed-major b3
    prm[7, 0:E // 2] = np.asarray(p["pe_gaussian"])[0]
    prm[7, E // 2:E] = np.asarray(p["pe_gaussian"])[1]
    prm[7, E:2 * E] = np.asarray(p["point_embed"])[1]
    prm[7, 2 * E:3 * E] = np.asarray(p["not_a_point"])[0]

    return {"mats": jnp.asarray(mats), "prm": jnp.asarray(prm)}


# ----------------------------- full SPG forward (one kernel + trivial reshapes) -------
@jax.jit
def spg_forward(image, mirrored, packed):
    img2 = image.reshape(B, C, HW)
    mir2 = mirrored.reshape(B, C, HW)
    out = spg_fused_call(img2, mir2, packed["mats"], packed["prm"])
    sparse = out[:, :SPARSE_W].reshape(B, 2, EMBED_DIM)
    dense = out[:, 128:].reshape(B, EMBED_DIM, S2H, S2W)           # embed-major layout == NCHW
    return sparse, dense


# ----------------------------- pure-JAX reference for verification --------------------
def reference_forward(image, mirrored, p):
    E = EMBED_DIM
    diff = jnp.mean(jnp.abs(image - mirrored), axis=1, keepdims=True)       # (B,1,H,W)
    mean_d = jnp.mean(diff, axis=(2, 3), keepdims=True)
    var = jnp.sum((diff - mean_d) ** 2, axis=(2, 3), keepdims=True) / (H * W - 1)
    thresh = mean_d + jnp.sqrt(var)
    mask = (diff > thresh).astype(jnp.float32)
    m2 = mask[:, 0]
    rows = jnp.arange(H, dtype=jnp.float32)[None, :, None]
    cols = jnp.arange(W, dtype=jnp.float32)[None, None, :]
    count = jnp.sum(m2, axis=(1, 2))
    denom = jnp.maximum(count, 1.0)
    cy = jnp.where(count > 0.5, jnp.sum(m2 * rows, axis=(1, 2)) / denom, H / 2.0)
    cx = jnp.where(count > 0.5, jnp.sum(m2 * cols, axis=(1, 2)) / denom, W / 2.0)
    x = (cx + 0.5) / INPUT_IMAGE_SIZE[1]
    y = (cy + 0.5) / INPUT_IMAGE_SIZE[0]
    coords = jnp.stack([2 * x - 1, 2 * y - 1], axis=-1)                     # (B,2)
    proj = (2 * math.pi) * (coords @ p["pe_gaussian"])                      # (B,E/2)
    pe = jnp.concatenate([jnp.sin(proj), jnp.cos(proj)], axis=-1)           # (B,E)
    row0 = pe + p["point_embed"][1][None]
    row1 = jnp.broadcast_to(p["not_a_point"], (B, E))
    sparse = jnp.stack([row0, row1], axis=1)

    def ln2d(xx, w, b):
        u = jnp.mean(xx, axis=1, keepdims=True)
        s = jnp.mean((xx - u) ** 2, axis=1, keepdims=True)
        return ((xx - u) / jnp.sqrt(s + LN_EPS)) * w[None, :, None, None] + b[None, :, None, None]

    dn = ('NCHW', 'OIHW', 'NCHW')
    y1 = lax.conv_general_dilated(mask, p["w1"], (2, 2), 'VALID', dimension_numbers=dn)
    y1 = _gelu_exact(ln2d(y1 + p["b1"][None, :, None, None], p["ln1_w"], p["ln1_b"]))
    y2 = lax.conv_general_dilated(y1, p["w2"], (2, 2), 'VALID', dimension_numbers=dn)
    y2 = _gelu_exact(ln2d(y2 + p["b2"][None, :, None, None], p["ln2_w"], p["ln2_b"]))
    y3 = lax.conv_general_dilated(y2, p["w3"], (1, 1), 'VALID', dimension_numbers=dn)
    dense = y3 + p["b3"][None, :, None, None]
    return sparse, dense


if __name__ == "__main__":
    key = jax.random.PRNGKey(0)
    k_img, k_mir, k_par = jax.random.split(key, 3)
    image = jax.random.normal(k_img, (B, C, H, W), jnp.float32)
    mirrored_image = jax.random.normal(k_mir, (B, C, H, W), jnp.float32)
    params = init_params(k_par)
    packed = pack_params(params)

    sparse, dense = spg_forward(image, mirrored_image, packed)
    sparse = jax.block_until_ready(sparse)
    dense = jax.block_until_ready(dense)

    ref_sparse, ref_dense = reference_forward(image, mirrored_image, params)
    ref_sparse = jax.block_until_ready(ref_sparse)
    ref_dense = jax.block_until_ready(ref_dense)

    assert sparse.shape == (B, 2, EMBED_DIM)
    assert dense.shape == (B, EMBED_DIM, H // 4, W // 4)
    np.testing.assert_allclose(np.asarray(sparse), np.asarray(ref_sparse), rtol=2e-4, atol=2e-4)
    np.testing.assert_allclose(np.asarray(dense), np.asarray(ref_dense), rtol=2e-4, atol=2e-4)
    print("KERNEL_OK")
</pallas_src>

<mosaic_0001>
module attributes {stable_mosaic.version = 11 : i64} {
  func.func @spg_fused_kernel(%arg0: memref<2x3x256xf32, #tpu.memory_space<vmem>>, %arg1: memref<2x3x256xf32, #tpu.memory_space<vmem>>, %arg2: memref<4x256x256xf32, #tpu.memory_space<vmem>>, %arg3: memref<8x512xf32, #tpu.memory_space<vmem>>, %arg4: memref<2x640xf32, #tpu.memory_space<vmem>>) attributes {dimension_semantics = [], scalar_prefetch = 0 : i64, scratch_operands = 0 : i64, tpu.core_type = #tpu.core_type<tc>} {
    %c0 = arith.constant 0 : index
    %c0_0 = arith.constant 0 : index
    %c0_1 = arith.constant 0 : index
    %0 = vector.load %arg0[%c0, %c0_0, %c0_1] : memref<2x3x256xf32, #tpu.memory_space<vmem>>, vector<2x3x256xf32>
    %c0_2 = arith.constant 0 : index
    %c0_3 = arith.constant 0 : index
    %c0_4 = arith.constant 0 : index
    %1 = vector.load %arg1[%c0_2, %c0_3, %c0_4] : memref<2x3x256xf32, #tpu.memory_space<vmem>>, vector<2x3x256xf32>
    %2 = arith.subf %0, %1 : vector<2x3x256xf32>
    %3 = math.absf %2 : vector<2x3x256xf32>
    %cst = arith.constant dense<0.000000e+00> : vector<2x256xf32>
    %4 = vector.multi_reduction <add>, %3, %cst [1] : vector<2x3x256xf32> to vector<2x256xf32>
    %cst_5 = arith.constant 3.000000e+00 : f32
    %5 = vector.broadcast %cst_5 : f32 to vector<2x256xf32>
    %6 = arith.divf %4, %5 : vector<2x256xf32>
    %cst_6 = arith.constant dense<0.000000e+00> : vector<2xf32>
    %7 = vector.multi_reduction <add>, %6, %cst_6 [1] : vector<2x256xf32> to vector<2xf32>
    %8 = vector.shape_cast %7 : vector<2xf32> to vector<2x1xf32>
    %cst_7 = arith.constant 2.560000e+02 : f32
    %9 = vector.broadcast %cst_7 : f32 to vector<2x1xf32>
    %10 = arith.divf %8, %9 : vector<2x1xf32>
    %11 = vector.broadcast %10 : vector<2x1xf32> to vector<2x256xf32>
    %12 = arith.subf %6, %11 : vector<2x256xf32>
    %13 = arith.mulf %12, %12 : vector<2x256xf32>
    %cst_8 = arith.constant dense<0.000000e+00> : vector<2xf32>
    %14 = vector.multi_reduction <add>, %13, %cst_8 [1] : vector<2x256xf32> to vector<2xf32>
    %15 = vector.shape_cast %14 : vector<2xf32> to vector<2x1xf32>
    %cst_9 = arith.constant 0.00392156886 : f32
    %16 = vector.broadcast %cst_9 : f32 to vector<2x1xf32>
    %17 = arith.mulf %15, %16 : vector<2x1xf32>
    %18 = math.sqrt %17 : vector<2x1xf32>
    %19 = arith.addf %10, %18 : vector<2x1xf32>
    %20 = vector.broadcast %19 : vector<2x1xf32> to vector<2x256xf32>
    %21 = arith.cmpf ogt, %6, %20 : vector<2x256xf32>
    %22 = arith.extui %21 : vector<2x256xi1> to vector<2x256xi32>
    %23 = arith.sitofp %22 : vector<2x256xi32> to vector<2x256xf32>
    %24 = tpu.iota {dimensions = array<i32: 1>} : vector<2x256xi32>
    %25 = arith.sitofp %24 : vector<2x256xi32> to vector<2x256xf32>
    %cst_10 = arith.constant 6.250000e-02 : f32
    %26 = vector.broadcast %cst_10 : f32 to vector<2x256xf32>
    %27 = arith.mulf %25, %26 : vector<2x256xf32>
    %28 = math.floor %27 : vector<2x256xf32>
    %cst_11 = arith.constant 1.600000e+01 : f32
    %29 = vector.broadcast %cst_11 : f32 to vector<2x256xf32>
    %30 = arith.mulf %28, %29 : vector<2x256xf32>
    %31 = arith.subf %25, %30 : vector<2x256xf32>
    %cst_12 = arith.constant dense<0.000000e+00> : vector<2xf32>
    %32 = vector.multi_reduction <add>, %23, %cst_12 [1] : vector<2x256xf32> to vector<2xf32>
    %33 = vector.shape_cast %32 : vector<2xf32> to vector<2x1xf32>
    %cst_13 = arith.constant 1.000000e+00 : f32
    %34 = vector.broadcast %cst_13 : f32 to vector<2x1xf32>
    %35 = arith.maximumf %33, %34 : vector<2x1xf32>
    %cst_14 = arith.constant 5.000000e-01 : f32
    %36 = vector.broadcast %cst_14 : f32 to vector<2x1xf32>
    %37 = arith.cmpf ogt, %33, %36 : vector<2x1xf32>
    %38 = arith.mulf %23, %28 : vector<2x256xf32>
    %cst_15 = arith.constant dense<0.000000e+00> : vector<2xf32>
    %39 = vector.multi_reduction <add>, %38, %cst_15 [1] : vector<2x256xf32> to vector<2xf32>
    %40 = vector.shape_cast %39 : vector<2xf32> to vector<2x1xf32>
    %41 = arith.divf %40, %35 : vector<2x1xf32>
    %cst_16 = arith.constant 8.000000e+00 : f32
    %42 = vector.broadcast %cst_16 : f32 to vector<2x1xf32>
    %43 = arith.select %37, %41, %42 : vector<2x1xi1>, vector<2x1xf32>
    %cst_17 = arith.constant 5.000000e-01 : f32
    %44 = vector.broadcast %cst_17 : f32 to vector<2x1xf32>
    %45 = arith.cmpf ogt, %33, %44 : vector<2x1xf32>
    %46 = arith.mulf %23, %31 : vector<2x256xf32>
    %cst_18 = arith.constant dense<0.000000e+00> : vector<2xf32>
    %47 = vector.multi_reduction <add>, %46, %cst_18 [1] : vector<2x256xf32> to vector<2xf32>
    %48 = vector.shape_cast %47 : vector<2xf32> to vector<2x1xf32>
    %49 = arith.divf %48, %35 : vector<2x1xf32>
    %cst_19 = arith.constant 8.000000e+00 : f32
    %50 = vector.broadcast %cst_19 : f32 to vector<2x1xf32>
    %51 = arith.select %45, %49, %50 : vector<2x1xi1>, vector<2x1xf32>
    %cst_20 = arith.constant 5.000000e-01 : f32
    %52 = vector.broadcast %cst_20 : f32 to vector<2x1xf32>
    %53 = arith.addf %51, %52 : vector<2x1xf32>
    %cst_21 = arith.constant 1.600000e+01 : f32
    %54 = vector.broadcast %cst_21 : f32 to vector<2x1xf32>
    %55 = arith.divf %53, %54 : vector<2x1xf32>
    %cst_22 = arith.constant 2.000000e+00 : f32
    %56 = vector.broadcast %cst_22 : f32 to vector<2x1xf32>
    %57 = arith.mulf %56, %55 : vector<2x1xf32>
    %cst_23 = arith.constant 1.000000e+00 : f32
    %58 = vector.broadcast %cst_23 : f32 to vector<2x1xf32>
    %59 = arith.subf %57, %58 : vector<2x1xf32>
    %cst_24 = arith.constant 5.000000e-01 : f32
    %60 = vector.broadcast %cst_24 : f32 to vector<2x1xf32>
    %61 = arith.addf %43, %60 : vector<2x1xf32>
    %cst_25 = arith.constant 1.600000e+01 : f32
    %62 = vector.broadcast %cst_25 : f32 to vector<2x1xf32>
    %63 = arith.divf %61, %62 : vector<2x1xf32>
    %cst_26 = arith.constant 2.000000e+00 : f32
    %64 = vector.broadcast %cst_26 : f32 to vector<2x1xf32>
    %65 = arith.mulf %64, %63 : vector<2x1xf32>
    %cst_27 = arith.constant 1.000000e+00 : f32
    %66 = vector.broadcast %cst_27 : f32 to vector<2x1xf32>
    %67 = arith.subf %65, %66 : vector<2x1xf32>
    %c7 = arith.constant 7 : index
    %c0_28 = arith.constant 0 : index
    %68 = vector.load %arg3[%c7, %c0_28] : memref<8x512xf32, #tpu.memory_space<vmem>>, vector<1x16xf32>
    %c7_29 = arith.constant 7 : index
    %c16 = arith.constant 16 : index
    %69 = vector.load %arg3[%c7_29, %c16] : memref<8x512xf32, #tpu.memory_space<vmem>>, vector<1x16xf32>
    %70 = vector.broadcast %59 : vector<2x1xf32> to vector<2x16xf32>
    %71 = vector.broadcast %68 : vector<1x16xf32> to vector<2x16xf32>
    %72 = arith.mulf %70, %71 : vector<2x16xf32>
    %73 = vector.broadcast %67 : vector<2x1xf32> to vector<2x16xf32>
    %74 = vector.broadcast %69 : vector<1x16xf32> to vector<2x16xf32>
    %75 = arith.mulf %73, %74 : vector<2x16xf32>
    %76 = arith.addf %72, %75 : vector<2x16xf32>
    %cst_30 = arith.constant 6.28318548 : f32
    %77 = vector.broadcast %cst_30 : f32 to vector<2x16xf32>
    %78 = arith.mulf %77, %76 : vector<2x16xf32>
    %79 = math.sin %78 : vector<2x16xf32>
    %80 = math.cos %78 : vector<2x16xf32>
    %81 = tpu.concatenate %79, %80 in 1 : vector<2x16xf32>, vector<2x16xf32> -> vector<2x32xf32>
    %c7_31 = arith.constant 7 : index
    %c32 = arith.constant 32 : index
    %82 = vector.load %arg3[%c7_31, %c32] : memref<8x512xf32, #tpu.memory_space<vmem>>, vector<1x32xf32>
    %83 = vector.broadcast %82 : vector<1x32xf32> to vector<2x32xf32>
    %84 = arith.addf %81, %83 : vector<2x32xf32>
    %c7_32 = arith.constant 7 : index
    %c64 = arith.constant 64 : index
    %85 = vector.load %arg3[%c7_32, %c64] : memref<8x512xf32, #tpu.memory_space<vmem>>, vector<1x32xf32>
    %86 = vector.shape_cast %85 : vector<1x32xf32> to vector<1x32xf32>
    %87 = vector.broadcast %86 : vector<1x32xf32> to vector<2x32xf32>
    %88 = tpu.concatenate %84, %87 in 1 : vector<2x32xf32>, vector<2x32xf32> -> vector<2x64xf32>
    %c0_33 = arith.constant 0 : index
    %c0_34 = arith.constant 0 : index
    %c0_35 = arith.constant 0 : index
    %89 = vector.load %arg2[%c0_33, %c0_34, %c0_35] : memref<4x256x256xf32, #tpu.memory_space<vmem>>, vector<1x256x256xf32>
    %90 = vector.shape_cast %89 : vector<1x256x256xf32> to vector<256x256xf32>
    %cst_36 = arith.constant dense<0.000000e+00> : vector<2x256xf32>
    %91 = tpu.matmul %23, %90, %cst_36 {dimension_numbers = #tpu.dot_dimension_numbers<[1], [0], [0], [1], [0, 0, 1, 1], [], []>} : vector<2x256xf32>, vector<256x256xf32>, vector<2x256xf32> -> vector<2x256xf32>
    %c0_37 = arith.constant 0 : index
    %c0_38 = arith.constant 0 : index
    %92 = vector.load %arg3[%c0_37, %c0_38] : memref<8x512xf32, #tpu.memory_space<vmem>>, vector<1x256xf32>
    %93 = vector.broadcast %92 : vector<1x256xf32> to vector<2x256xf32>
    %94 = arith.addf %91, %93 : vector<2x256xf32>
    %c1 = arith.constant 1 : index
    %c0_39 = arith.constant 0 : index
    %95 = vector.load %arg3[%c1, %c0_39] : memref<8x512xf32, #tpu.memory_space<vmem>>, vector<1x256xf32>
    %c2 = arith.constant 2 : index
    %c0_40 = arith.constant 0 : index
    %96 = vector.load %arg3[%c2, %c0_40] : memref<8x512xf32, #tpu.memory_space<vmem>>, vector<1x256xf32>
    %97 = tpu.iota {dimensions = array<i32: 1>} : vector<2x256xi32>
    %c4_i32 = arith.constant 4 : i32
    %c0_i32 = arith.constant 0 : i32
    %98 = arith.cmpi eq, %c4_i32, %c0_i32 : i32
    %c1_i32 = arith.constant 1 : i32
    %99 = arith.select %98, %c1_i32, %c4_i32 : i32
    %100 = vector.broadcast %99 : i32 to vector<2x256xi32>
    %101 = arith.remsi %97, %100 : vector<2x256xi32>
    %c0_i32_41 = arith.constant 0 : i32
    %102 = vector.broadcast %c0_i32_41 : i32 to vector<2x256xi32>
    %103 = arith.cmpi ne, %101, %102 : vector<2x256xi32>
    %c0_i32_42 = arith.constant 0 : i32
    %104 = vector.broadcast %c0_i32_42 : i32 to vector<2x256xi32>
    %105 = arith.cmpi slt, %101, %104 : vector<2x256xi32>
    %c0_i32_43 = arith.constant 0 : i32
    %106 = arith.cmpi slt, %99, %c0_i32_43 : i32
    %107 = vector.broadcast %106 : i1 to vector<2x256xi1>
    %108 = vector.broadcast %107 : vector<2x256xi1> to vector<2x256xi1>
    %109 = arith.xori %105, %108 : vector<2x256xi1>
    %110 = arith.andi %109, %103 : vector<2x256xi1>
    %111 = vector.broadcast %99 : i32 to vector<2x256xi32>
    %112 = arith.addi %101, %111 : vector<2x256xi32>
    %113 = arith.select %110, %112, %101 : vector<2x256xi1>, vector<2x256xi32>
    %c1_i32_44 = arith.constant 1 : i32
    %114 = tpu.dynamic_rotate %94 by %c1_i32_44 dim 1 : vector<2x256xf32>, i32 -> vector<2x256xf32>
    %c253_i32 = arith.constant 253 : i32
    %115 = tpu.dynamic_rotate %94 by %c253_i32 dim 1 : vector<2x256xf32>, i32 -> vector<2x256xf32>
    %c1_i32_45 = arith.constant 1 : i32
    %116 = vector.broadcast %c1_i32_45 : i32 to vector<2x256xi32>
    %117 = arith.cmpi sge, %113, %116 : vector<2x256xi32>
    %118 = arith.select %117, %114, %115 : vector<2x256xi1>, vector<2x256xf32>
    %119 = arith.addf %94, %118 : vector<2x256xf32>
    %c2_i32 = arith.constant 2 : i32
    %120 = tpu.dynamic_rotate %119 by %c2_i32 dim 1 : vector<2x256xf32>, i32 -> vector<2x256xf32>
    %c254_i32 = arith.constant 254 : i32
    %121 = tpu.dynamic_rotate %119 by %c254_i32 dim 1 : vector<2x256xf32>, i32 -> vector<2x256xf32>
    %c2_i32_46 = arith.constant 2 : i32
    %122 = vector.broadcast %c2_i32_46 : i32 to vector<2x256xi32>
    %123 = arith.cmpi sge, %113, %122 : vector<2x256xi32>
    %124 = arith.select %123, %120, %121 : vector<2x256xi1>, vector<2x256xf32>
    %125 = arith.addf %119, %124 : vector<2x256xf32>
    %cst_47 = arith.constant 2.500000e-01 : f32
    %126 = vector.broadcast %cst_47 : f32 to vector<2x256xf32>
    %127 = arith.mulf %125, %126 : vector<2x256xf32>
    %128 = arith.subf %94, %127 : vector<2x256xf32>
    %129 = arith.mulf %128, %128 : vector<2x256xf32>
    %130 = tpu.iota {dimensions = array<i32: 1>} : vector<2x256xi32>
    %c4_i32_48 = arith.constant 4 : i32
    %c0_i32_49 = arith.constant 0 : i32
    %131 = arith.cmpi eq, %c4_i32_48, %c0_i32_49 : i32
    %c1_i32_50 = arith.constant 1 : i32
    %132 = arith.select %131, %c1_i32_50, %c4_i32_48 : i32
    %133 = vector.broadcast %132 : i32 to vector<2x256xi32>
    %134 = arith.remsi %130, %133 : vector<2x256xi32>
    %c0_i32_51 = arith.constant 0 : i32
    %135 = vector.broadcast %c0_i32_51 : i32 to vector<2x256xi32>
    %136 = arith.cmpi ne, %134, %135 : vector<2x256xi32>
    %c0_i32_52 = arith.constant 0 : i32
    %137 = vector.broadcast %c0_i32_52 : i32 to vector<2x256xi32>
    %138 = arith.cmpi slt, %134, %137 : vector<2x256xi32>
    %c0_i32_53 = arith.constant 0 : i32
    %139 = arith.cmpi slt, %132, %c0_i32_53 : i32
    %140 = vector.broadcast %139 : i1 to vector<2x256xi1>
    %141 = vector.broadcast %140 : vector<2x256xi1> to vector<2x256xi1>
    %142 = arith.xori %138, %141 : vector<2x256xi1>
    %143 = arith.andi %142, %136 : vector<2x256xi1>
    %144 = vector.broadcast %132 : i32 to vector<2x256xi32>
    %145 = arith.addi %134, %144 : vector<2x256xi32>
    %146 = arith.select %143, %145, %134 : vector<2x256xi1>, vector<2x256xi32>
    %c1_i32_54 = arith.constant 1 : i32
    %147 = tpu.dynamic_rotate %129 by %c1_i32_54 dim 1 : vector<2x256xf32>, i32 -> vector<2x256xf32>
    %c253_i32_55 = arith.constant 253 : i32
    %148 = tpu.dynamic_rotate %129 by %c253_i32_55 dim 1 : vector<2x256xf32>, i32 -> vector<2x256xf32>
    %c1_i32_56 = arith.constant 1 : i32
    %149 = vector.broadcast %c1_i32_56 : i32 to vector<2x256xi32>
    %150 = arith.cmpi sge, %146, %149 : vector<2x256xi32>
    %151 = arith.select %150, %147, %148 : vector<2x256xi1>, vector<2x256xf32>
    %152 = arith.addf %129, %151 : vector<2x256xf32>
    %c2_i32_57 = arith.constant 2 : i32
    %153 = tpu.dynamic_rotate %152 by %c2_i32_57 dim 1 : vector<2x256xf32>, i32 -> vector<2x256xf32>
    %c254_i32_58 = arith.constant 254 : i32
    %154 = tpu.dynamic_rotate %152 by %c254_i32_58 dim 1 : vector<2x256xf32>, i32 -> vector<2x256xf32>
    %c2_i32_59 = arith.constant 2 : i32
    %155 = vector.broadcast %c2_i32_59 : i32 to vector<2x256xi32>
    %156 = arith.cmpi sge, %146, %155 : vector<2x256xi32>
    %157 = arith.select %156, %153, %154 : vector<2x256xi1>, vector<2x256xf32>
    %158 = arith.addf %152, %157 : vector<2x256xf32>
    %cst_60 = arith.constant 2.500000e-01 : f32
    %159 = vector.broadcast %cst_60 : f32 to vector<2x256xf32>
    %160 = arith.mulf %158, %159 : vector<2x256xf32>
    %cst_61 = arith.constant 9.99999997E-7 : f32
    %161 = vector.broadcast %cst_61 : f32 to vector<2x256xf32>
    %162 = arith.addf %160, %161 : vector<2x256xf32>
    %163 = math.rsqrt %162 : vector<2x256xf32>
    %164 = arith.mulf %128, %163 : vector<2x256xf32>
    %165 = vector.broadcast %95 : vector<1x256xf32> to vector<2x256xf32>
    %166 = arith.mulf %164, %165 : vector<2x256xf32>
    %167 = vector.broadcast %96 : vector<1x256xf32> to vector<2x256xf32>
    %168 = arith.addf %166, %167 : vector<2x256xf32>
    %cst_62 = arith.constant 5.000000e-01 : f32
    %169 = vector.broadcast %cst_62 : f32 to vector<2x256xf32>
    %170 = arith.mulf %169, %168 : vector<2x256xf32>
    %cst_63 = arith.constant 2.000000e+00 : f32
    %171 = math.sqrt %cst_63 : f32
    %172 = vector.broadcast %171 : f32 to vector<2x256xf32>
    %173 = arith.divf %168, %172 : vector<2x256xf32>
    %174 = math.erf %173 : vector<2x256xf32>
    %cst_64 = arith.constant 1.000000e+00 : f32
    %175 = vector.broadcast %cst_64 : f32 to vector<2x256xf32>
    %176 = arith.addf %175, %174 : vector<2x256xf32>
    %177 = arith.mulf %170, %176 : vector<2x256xf32>
    %c1_65 = arith.constant 1 : index
    %c0_66 = arith.constant 0 : index
    %c0_67 = arith.constant 0 : index
    %178 = vector.load %arg2[%c1_65, %c0_66, %c0_67] : memref<4x256x256xf32, #tpu.memory_space<vmem>>, vector<1x256x256xf32>
    %179 = vector.shape_cast %178 : vector<1x256x256xf32> to vector<256x256xf32>
    %cst_68 = arith.constant dense<0.000000e+00> : vector<2x256xf32>
    %180 = tpu.matmul %177, %179, %cst_68 {dimension_numbers = #tpu.dot_dimension_numbers<[1], [0], [0], [1], [0, 0, 1, 1], [], []>} : vector<2x256xf32>, vector<256x256xf32>, vector<2x256xf32> -> vector<2x256xf32>
    %c3 = arith.constant 3 : index
    %c0_69 = arith.constant 0 : index
    %181 = vector.load %arg3[%c3, %c0_69] : memref<8x512xf32, #tpu.memory_space<vmem>>, vector<1x256xf32>
    %182 = vector.broadcast %181 : vector<1x256xf32> to vector<2x256xf32>
    %183 = arith.addf %180, %182 : vector<2x256xf32>
    %c4 = arith.constant 4 : index
    %c0_70 = arith.constant 0 : index
    %184 = vector.load %arg3[%c4, %c0_70] : memref<8x512xf32, #tpu.memory_space<vmem>>, vector<1x256xf32>
    %c5 = arith.constant 5 : index
    %c0_71 = arith.constant 0 : index
    %185 = vector.load %arg3[%c5, %c0_71] : memref<8x512xf32, #tpu.memory_space<vmem>>, vector<1x256xf32>
    %186 = tpu.iota {dimensions = array<i32: 1>} : vector<2x256xi32>
    %c16_i32 = arith.constant 16 : i32
    %c0_i32_72 = arith.constant 0 : i32
    %187 = arith.cmpi eq, %c16_i32, %c0_i32_72 : i32
    %c1_i32_73 = arith.constant 1 : i32
    %188 = arith.select %187, %c1_i32_73, %c16_i32 : i32
    %189 = vector.broadcast %188 : i32 to vector<2x256xi32>
    %190 = arith.remsi %186, %189 : vector<2x256xi32>
    %c0_i32_74 = arith.constant 0 : i32
    %191 = vector.broadcast %c0_i32_74 : i32 to vector<2x256xi32>
    %192 = arith.cmpi ne, %190, %191 : vector<2x256xi32>
    %c0_i32_75 = arith.constant 0 : i32
    %193 = vector.broadcast %c0_i32_75 : i32 to vector<2x256xi32>
    %194 = arith.cmpi slt, %190, %193 : vector<2x256xi32>
    %c0_i32_76 = arith.constant 0 : i32
    %195 = arith.cmpi slt, %188, %c0_i32_76 : i32
    %196 = vector.broadcast %195 : i1 to vector<2x256xi1>
    %197 = vector.broadcast %196 : vector<2x256xi1> to vector<2x256xi1>
    %198 = arith.xori %194, %197 : vector<2x256xi1>
    %199 = arith.andi %198, %192 : vector<2x256xi1>
    %200 = vector.broadcast %188 : i32 to vector<2x256xi32>
    %201 = arith.addi %190, %200 : vector<2x256xi32>
    %202 = arith.select %199, %201, %190 : vector<2x256xi1>, vector<2x256xi32>
    %c1_i32_77 = arith.constant 1 : i32
    %203 = tpu.dynamic_rotate %183 by %c1_i32_77 dim 1 : vector<2x256xf32>, i32 -> vector<2x256xf32>
    %c241_i32 = arith.constant 241 : i32
    %204 = tpu.dynamic_rotate %183 by %c241_i32 dim 1 : vector<2x256xf32>, i32 -> vector<2x256xf32>
    %c1_i32_78 = arith.constant 1 : i32
    %205 = vector.broadcast %c1_i32_78 : i32 to vector<2x256xi32>
    %206 = arith.cmpi sge, %202, %205 : vector<2x256xi32>
    %207 = arith.select %206, %203, %204 : vector<2x256xi1>, vector<2x256xf32>
    %208 = arith.addf %183, %207 : vector<2x256xf32>
    %c2_i32_79 = arith.constant 2 : i32
    %209 = tpu.dynamic_rotate %208 by %c2_i32_79 dim 1 : vector<2x256xf32>, i32 -> vector<2x256xf32>
    %c242_i32 = arith.constant 242 : i32
    %210 = tpu.dynamic_rotate %208 by %c242_i32 dim 1 : vector<2x256xf32>, i32 -> vector<2x256xf32>
    %c2_i32_80 = arith.constant 2 : i32
    %211 = vector.broadcast %c2_i32_80 : i32 to vector<2x256xi32>
    %212 = arith.cmpi sge, %202, %211 : vector<2x256xi32>
    %213 = arith.select %212, %209, %210 : vector<2x256xi1>, vector<2x256xf32>
    %214 = arith.addf %208, %213 : vector<2x256xf32>
    %c4_i32_81 = arith.constant 4 : i32
    %215 = tpu.dynamic_rotate %214 by %c4_i32_81 dim 1 : vector<2x256xf32>, i32 -> vector<2x256xf32>
    %c244_i32 = arith.constant 244 : i32
    %216 = tpu.dynamic_rotate %214 by %c244_i32 dim 1 : vector<2x256xf32>, i32 -> vector<2x256xf32>
    %c4_i32_82 = arith.constant 4 : i32
    %217 = vector.broadcast %c4_i32_82 : i32 to vector<2x256xi32>
    %218 = arith.cmpi sge, %202, %217 : vector<2x256xi32>
    %219 = arith.select %218, %215, %216 : vector<2x256xi1>, vector<2x256xf32>
    %220 = arith.addf %214, %219 : vector<2x256xf32>
    %c8_i32 = arith.constant 8 : i32
    %221 = tpu.dynamic_rotate %220 by %c8_i32 dim 1 : vector<2x256xf32>, i32 -> vector<2x256xf32>
    %c248_i32 = arith.constant 248 : i32
    %222 = tpu.dynamic_rotate %220 by %c248_i32 dim 1 : vector<2x256xf32>, i32 -> vector<2x256xf32>
    %c8_i32_83 = arith.constant 8 : i32
    %223 = vector.broadcast %c8_i32_83 : i32 to vector<2x256xi32>
    %224 = arith.cmpi sge, %202, %223 : vector<2x256xi32>
    %225 = arith.select %224, %221, %222 : vector<2x256xi1>, vector<2x256xf32>
    %226 = arith.addf %220, %225 : vector<2x256xf32>
    %cst_84 = arith.constant 6.250000e-02 : f32
    %227 = vector.broadcast %cst_84 : f32 to vector<2x256xf32>
    %228 = arith.mulf %226, %227 : vector<2x256xf32>
    %229 = arith.subf %183, %228 : vector<2x256xf32>
    %230 = arith.mulf %229, %229 : vector<2x256xf32>
    %231 = tpu.iota {dimensions = array<i32: 1>} : vector<2x256xi32>
    %c16_i32_85 = arith.constant 16 : i32
    %c0_i32_86 = arith.constant 0 : i32
    %232 = arith.cmpi eq, %c16_i32_85, %c0_i32_86 : i32
    %c1_i32_87 = arith.constant 1 : i32
    %233 = arith.select %232, %c1_i32_87, %c16_i32_85 : i32
    %234 = vector.broadcast %233 : i32 to vector<2x256xi32>
    %235 = arith.remsi %231, %234 : vector<2x256xi32>
    %c0_i32_88 = arith.constant 0 : i32
    %236 = vector.broadcast %c0_i32_88 : i32 to vector<2x256xi32>
    %237 = arith.cmpi ne, %235, %236 : vector<2x256xi32>
    %c0_i32_89 = arith.constant 0 : i32
    %238 = vector.broadcast %c0_i32_89 : i32 to vector<2x256xi32>
    %239 = arith.cmpi slt, %235, %238 : vector<2x256xi32>
    %c0_i32_90 = arith.constant 0 : i32
    %240 = arith.cmpi slt, %233, %c0_i32_90 : i32
    %241 = vector.broadcast %240 : i1 to vector<2x256xi1>
    %242 = vector.broadcast %241 : vector<2x256xi1> to vector<2x256xi1>
    %243 = arith.xori %239, %242 : vector<2x256xi1>
    %244 = arith.andi %243, %237 : vector<2x256xi1>
    %245 = vector.broadcast %233 : i32 to vector<2x256xi32>
    %246 = arith.addi %235, %245 : vector<2x256xi32>
    %247 = arith.select %244, %246, %235 : vector<2x256xi1>, vector<2x256xi32>
    %c1_i32_91 = arith.constant 1 : i32
    %248 = tpu.dynamic_rotate %230 by %c1_i32_91 dim 1 : vector<2x256xf32>, i32 -> vector<2x256xf32>
    %c241_i32_92 = arith.constant 241 : i32
    %249 = tpu.dynamic_rotate %230 by %c241_i32_92 dim 1 : vector<2x256xf32>, i32 -> vector<2x256xf32>
    %c1_i32_93 = arith.constant 1 : i32
    %250 = vector.broadcast %c1_i32_93 : i32 to vector<2x256xi32>
    %251 = arith.cmpi sge, %247, %250 : vector<2x256xi32>
    %252 = arith.select %251, %248, %249 : vector<2x256xi1>, vector<2x256xf32>
    %253 = arith.addf %230, %252 : vector<2x256xf32>
    %c2_i32_94 = arith.constant 2 : i32
    %254 = tpu.dynamic_rotate %253 by %c2_i32_94 dim 1 : vector<2x256xf32>, i32 -> vector<2x256xf32>
    %c242_i32_95 = arith.constant 242 : i32
    %255 = tpu.dynamic_rotate %253 by %c242_i32_95 dim 1 : vector<2x256xf32>, i32 -> vector<2x256xf32>
    %c2_i32_96 = arith.constant 2 : i32
    %256 = vector.broadcast %c2_i32_96 : i32 to vector<2x256xi32>
    %257 = arith.cmpi sge, %247, %256 : vector<2x256xi32>
    %258 = arith.select %257, %254, %255 : vector<2x256xi1>, vector<2x256xf32>
    %259 = arith.addf %253, %258 : vector<2x256xf32>
    %c4_i32_97 = arith.constant 4 : i32
    %260 = tpu.dynamic_rotate %259 by %c4_i32_97 dim 1 : vector<2x256xf32>, i32 -> vector<2x256xf32>
    %c244_i32_98 = arith.constant 244 : i32
    %261 = tpu.dynamic_rotate %259 by %c244_i32_98 dim 1 : vector<2x256xf32>, i32 -> vector<2x256xf32>
    %c4_i32_99 = arith.constant 4 : i32
    %262 = vector.broadcast %c4_i32_99 : i32 to vector<2x256xi32>
    %263 = arith.cmpi sge, %247, %262 : vector<2x256xi32>
    %264 = arith.select %263, %260, %261 : vector<2x256xi1>, vector<2x256xf32>
    %265 = arith.addf %259, %264 : vector<2x256xf32>
    %c8_i32_100 = arith.constant 8 : i32
    %266 = tpu.dynamic_rotate %265 by %c8_i32_100 dim 1 : vector<2x256xf32>, i32 -> vector<2x256xf32>
    %c248_i32_101 = arith.constant 248 : i32
    %267 = tpu.dynamic_rotate %265 by %c248_i32_101 dim 1 : vector<2x256xf32>, i32 -> vector<2x256xf32>
    %c8_i32_102 = arith.constant 8 : i32
    %268 = vector.broadcast %c8_i32_102 : i32 to vector<2x256xi32>
    %269 = arith.cmpi sge, %247, %268 : vector<2x256xi32>
    %270 = arith.select %269, %266, %267 : vector<2x256xi1>, vector<2x256xf32>
    %271 = arith.addf %265, %270 : vector<2x256xf32>
    %cst_103 = arith.constant 6.250000e-02 : f32
    %272 = vector.broadcast %cst_103 : f32 to vector<2x256xf32>
    %273 = arith.mulf %271, %272 : vector<2x256xf32>
    %cst_104 = arith.constant 9.99999997E-7 : f32
    %274 = vector.broadcast %cst_104 : f32 to vector<2x256xf32>
    %275 = arith.addf %273, %274 : vector<2x256xf32>
    %276 = math.rsqrt %275 : vector<2x256xf32>
    %277 = arith.mulf %229, %276 : vector<2x256xf32>
    %278 = vector.broadcast %184 : vector<1x256xf32> to vector<2x256xf32>
    %279 = arith.mulf %277, %278 : vector<2x256xf32>
    %280 = vector.broadcast %185 : vector<1x256xf32> to vector<2x256xf32>
    %281 = arith.addf %279, %280 : vector<2x256xf32>
    %cst_105 = arith.constant 5.000000e-01 : f32
    %282 = vector.broadcast %cst_105 : f32 to vector<2x256xf32>
    %283 = arith.mulf %282, %281 : vector<2x256xf32>
    %cst_106 = arith.constant 2.000000e+00 : f32
    %284 = math.sqrt %cst_106 : f32
    %285 = vector.broadcast %284 : f32 to vector<2x256xf32>
    %286 = arith.divf %281, %285 : vector<2x256xf32>
    %287 = math.erf %286 : vector<2x256xf32>
    %cst_107 = arith.constant 1.000000e+00 : f32
    %288 = vector.broadcast %cst_107 : f32 to vector<2x256xf32>
    %289 = arith.addf %288, %287 : vector<2x256xf32>
    %290 = arith.mulf %283, %289 : vector<2x256xf32>
    %c2_108 = arith.constant 2 : index
    %c0_109 = arith.constant 0 : index
    %c0_110 = arith.constant 0 : index
    %291 = vector.load %arg2[%c2_108, %c0_109, %c0_110] : memref<4x256x256xf32, #tpu.memory_space<vmem>>, vector<1x256x256xf32>
    %292 = vector.shape_cast %291 : vector<1x256x256xf32> to vector<256x256xf32>
    %cst_111 = arith.constant dense<0.000000e+00> : vector<2x256xf32>
    %293 = tpu.matmul %290, %292, %cst_111 {dimension_numbers = #tpu.dot_dimension_numbers<[1], [0], [0], [1], [0, 0, 1, 1], [], []>} : vector<2x256xf32>, vector<256x256xf32>, vector<2x256xf32> -> vector<2x256xf32>
    %c3_112 = arith.constant 3 : index
    %c0_113 = arith.constant 0 : index
    %c0_114 = arith.constant 0 : index
    %294 = vector.load %arg2[%c3_112, %c0_113, %c0_114] : memref<4x256x256xf32, #tpu.memory_space<vmem>>, vector<1x256x256xf32>
    %295 = vector.shape_cast %294 : vector<1x256x256xf32> to vector<256x256xf32>
    %cst_115 = arith.constant dense<0.000000e+00> : vector<2x256xf32>
    %296 = tpu.matmul %290, %295, %cst_115 {dimension_numbers = #tpu.dot_dimension_numbers<[1], [0], [0], [1], [0, 0, 1, 1], [], []>} : vector<2x256xf32>, vector<256x256xf32>, vector<2x256xf32> -> vector<2x256xf32>
    %297 = tpu.concatenate %293, %296 in 1 : vector<2x256xf32>, vector<2x256xf32> -> vector<2x512xf32>
    %c6 = arith.constant 6 : index
    %c0_116 = arith.constant 0 : index
    %298 = vector.load %arg3[%c6, %c0_116] : memref<8x512xf32, #tpu.memory_space<vmem>>, vector<1x512xf32>
    %299 = vector.broadcast %298 : vector<1x512xf32> to vector<2x512xf32>
    %300 = arith.addf %297, %299 : vector<2x512xf32>
    %cst_117 = arith.constant 0.000000e+00 : f32
    %301 = vector.broadcast %cst_117 : f32 to vector<2x64xf32>
    %302 = tpu.concatenate %88, %301, %300 in 1 : vector<2x64xf32>, vector<2x64xf32>, vector<2x512xf32> -> vector<2x640xf32>
    %c0_118 = arith.constant 0 : index
    %c0_119 = arith.constant 0 : index
    %303 = vector.load %arg4[%c0_118, %c0_119] : memref<2x640xf32, #tpu.memory_space<vmem>>, vector<2x640xf32>
    tpu.vector_store %arg4[%c0_118, %c0_119], %302 {strides = array<i32>} : memref<2x640xf32, #tpu.memory_space<vmem>>, vector<2x640xf32>,
    return
  }
}

</mosaic_0001>

<bundles_post_ra>
// kernel: spg_forward.1
= control target key start
LH: loop header
LB: loop body
LE: loop exit
PB: predicated region body
PF: predicated region fallthrough
CT: control target
= control target key end

     0   :  { %9 = vsyncpa [#allocation3], 0  ;;  %s1817_s15 = smov [#allocation2]   ;;  %s2343_s0 = inlined_call_operand.vmem [shape: f32[2,3,256], index: 0, kind: input, shape index: {}]   ;;  %s2344_s1 = inlined_call_operand.vmem [shape: f32[2,3,256], index: 1, kind: input, shape index: {}]   ;;  %s2345_s2 = inlined_call_operand.hbm [shape: f32[4,256,256], index: 2, kind: input, shape index: {}]   ;;  %s2346_s3 = inlined_call_operand.vmem [shape: f32[8,512], index: 3, kind: input, shape index: {}]   ;;  %s2347_s4 = inlined_call_operand.vmem [shape: f32[2,640], index: 4, kind: output, shape index: {}]  }
   0x1   :  { %s19_s16 = sshll.u32 %s1817_s15, 4  ;;  %s1793_s19 = scalar_lea.hbm %s2345_s2, 32768  ;;  %s20_s16 = int_to_ptr.vmem [resolvable:$true] %s19_s16 }
   0x2   :  { %p1794_p0 = scmp.ne.s32.totalorder %s2345_s2, %s1793_s19  ;;  %p1797_p1 = scmp.lt.u32.totalorder %s1793_s19, %s2345_s2 }
   0x4   :  { %p1799_p2 = pnand %p1797_p1, %p1794_p0 }
   0x6   :  { %1802 = shalt.err (!%p1799_p2)
}
   0x7   :  { %s1803_s24 = scalar_lea.vmem %s20_s16, 32768  ;;  %p1808_p4 = scmp.lt.s32.totalorder %s20_s16, %s20_s16 }
   0x8   :  { %p1804_p3 = scmp.ne.s32.totalorder %s20_s16, %s1803_s24  ;;  %p1809_p5 = scmp.lt.s32.totalorder %s1803_s24, %s1803_s24 }
   0xa   :  { %p1810_p6 = por %p1809_p5, %p1808_p4 }
   0xc   :  { %p1811_p7 = pnand %p1810_p6, %p1804_p3 }
   0xe   :  { %1814 = shalt.err (!%p1811_p7)
}
   0xf   :  { %s1818_s25 = smov 256   ;;  %s1819_s26 = smov 16  }
  0x10   :  { %25 = dma.hbm_to_vmem [thread:$0]  %s2345_s2, 32768, %s20_s16, [#allocation3], %s1818_s25, %s1818_s25, %s1819_s26  }
  0x11   :  { %1815 = dma.done.wait [#allocation3], 32768  }
  0x12   :  { %1816 = vsyncadd [#allocation3], 4294934528  ;;  %v31_v0 = vld [vmem:[%s2343_s0] sm:$0x77]  ;;  %v32_v1 = vld [vmem:[%s2343_s0 + $0x8] sm:$0x77] }
  0x13   :  { %v33_v2 = vld [vmem:[%s2344_s1] sm:$0x77]  ;;  %v34_v3 = vld [vmem:[%s2344_s1 + $0x8] sm:$0x77]  ;;  %vm45_vm0 = vcmask 1042432   ;;  %vm83_vm1 = vcmask 1041409  }
  0x14   :  { %v35_v4 = vsub.f32 %v31_v0, %v33_v2  ;;  %v36_v5 = vsub.f32 %v32_v1, %v34_v3  ;;  %vm88_vm2 = vcmask 1041408   ;;  %v460_v47 = vld [vmem:[#allocation2 + $0x8] sm:$0xff]  ;;  %v462_v48 = vld [vmem:[#allocation2 + $0x18] sm:$0xff]  ;;  %v459_v49 = vld [vmem:[#allocation2] sm:$0xff]  ;;  %s1821_s2 = smov 125   ;;  %s1822_s11 = smov 1  }
  0x15   :  { %v1486_v50 = vpack.c.bf16 %v462_v48, %v460_v47  ;;  %v461_v51 = vld [vmem:[#allocation2 + $0x10] sm:$0xff]  ;;  %v464_v52 = vld [vmem:[#allocation2 + $0x28] sm:$0xff]  ;;  %v466_v53 = vld [vmem:[#allocation2 + $0x38] sm:$0xff]  ;;  %s1823_s12 = smov 2   ;;  %s1824_s13 = smov 126  }
  0x16   :  { %v37_v6 = vand.u32 2147483647, %v35_v4  ;;  %v38_v7 = vand.u32 2147483647, %v36_v5  ;;  %v1488_v54 = vpack.c.bf16 %v461_v51, %v459_v49  ;;  %v1490_v55 = vpack.c.bf16 %v466_v53, %v464_v52  ;;  %v463_v56 = vld [vmem:[#allocation2 + $0x20] sm:$0xff]  ;;  %v465_v57 = vld [vmem:[#allocation2 + $0x30] sm:$0xff] }
  0x17   :  { %v468_v58 = vld [vmem:[#allocation2 + $0x48] sm:$0xff]  ;;  %1487 = vmatprep.subr.bf16.mxu0 %v1486_v50  ;;  %v470_v59 = vld [vmem:[#allocation2 + $0x58] sm:$0xff]  ;;  %v1492_v60 = vpack.c.bf16 %v465_v57, %v463_v56  ;;  %v467_v62 = vld [vmem:[#allocation2 + $0x40] sm:$0xff]  ;;  %s1825_s20 = smov 113   ;;  %s1826_s21 = smov 114  }
  0x18   :  { %v41_v8 = vcombine.high %v37_v6, %v37_v6  ;;  %v46_v9 = vsel %vm45_vm0, %v37_v6, 0.0  ;;  %v42_v10 = vcombine.high %v38_v7, %v38_v7  ;;  %v60_v12 = vsel %vm45_vm0, %v38_v7, 0.0  ;;  %1489 = vmatpush1.bf16.msra.mxu0 %v1488_v54  ;;  %v469_v63 = vld [vmem:[#allocation2 + $0x50] sm:$0xff]  ;;  %v472_v0 = vld [vmem:[#allocation2 + $0x68] sm:$0xff]  ;;  %v474_v1 = vld [vmem:[#allocation2 + $0x78] sm:$0xff]  ;;  %s1827_s22 = smov 4  }
  0x19   :  { %v47_v11 = vrot.slane %v46_v9, 4  ;;  %v61_v14 = vrot.slane %v60_v12, 4  ;;  %1491 = vmatprep.subr.bf16.mxu0 %v1490_v55  ;;  %v1494_v61 = vpack.c.bf16 %v470_v59, %v468_v58  ;;  %v1496_v2 = vpack.c.bf16 %v469_v63, %v467_v62  ;;  %v471_v4 = vld [vmem:[#allocation2 + $0x60] sm:$0xff]  ;;  %v473_v5 = vld [vmem:[#allocation2 + $0x70] sm:$0xff]  ;;  %v476_v6 = vld [vmem:[#allocation2 + $0x88] sm:$0xff]  ;;  %s1828_s23 = smov 116  }
  0x1a   :  { %v53_v13 = vsel %vm45_vm0, %v41_v8, 0.0  ;;  %v67_v17 = vsel %vm45_vm0, %v42_v10, 0.0  ;;  %v1498_v3 = vpack.c.bf16 %v474_v1, %v472_v0  ;;  %v478_v7 = vld [vmem:[#allocation2 + $0x98] sm:$0xff]  ;;  %v1500_v8 = vpack.c.bf16 %v473_v5, %v471_v4  ;;  %v475_v10 = vld [vmem:[#allocation2 + $0x80] sm:$0xff]  ;;  %v497_v63 = vld [vmem:[#allocation2 + $0x130] sm:$0xff]  ;;  %s1829_s24 = smov 8  }
  0x1b   :  { %v48_v15 = vadd.f32 %v47_v11, %v46_v9  ;;  %v54_v16 = vrot.slane %v53_v13, 4  ;;  %v62_v18 = vadd.f32 %v61_v14, %v60_v12  ;;  %v68_v19 = vrot.slane %v67_v17, 4  ;;  %v477_v11 = vld [vmem:[#allocation2 + $0x90] sm:$0xff]  ;;  %v480_v12 = vld [vmem:[#allocation2 + $0xa8] sm:$0xff]  ;;  %v495_v62 = vld [vmem:[#allocation2 + $0x120] sm:$0xff]  ;;  %s1830_s25 = smov 120  }
  0x1c   :  { %1493 = vmatpush1.bf16.msra.mxu0 %v1492_v60  ;;  %v1502_v9 = vpack.c.bf16 %v478_v7, %v476_v6  ;;  %v1504_v14 = vpack.c.bf16 %v477_v11, %v475_v10  ;;  %v1524_v0 = vpack.c.bf16 %v497_v63, %v495_v62  ;;  %v500_v1 = vld [vmem:[#allocation2 + $0x148] sm:$0xff]  ;;  %v499_v4 = vld [vmem:[#allocation2 + $0x140] sm:$0xff]  ;;  %v501_v5 = vld [vmem:[#allocation2 + $0x150] sm:$0xff]  ;;  %v1820_v63 = vmov 0.0   ;;  %s1831_s7 = smov 112   ;;  %s1832_s8 = smov 96  }
  0x1d   :  { %v49_v20 = vrot.slane %v48_v15, 2  ;;  %v55_v21 = vadd.f32 %v54_v16, %v53_v13  ;;  %v63_v22 = vrot.slane %v62_v18, 2  ;;  %v69_v23 = vadd.f32 %v68_v19, %v67_v17  ;;  %1495 = vmatprep.subr.bf16.mxu0 %v1494_v61  ;;  %v482_v13 = vld [vmem:[#allocation2 + $0xb8] sm:$0xff]  ;;  %v479_v16 = vld [vmem:[#allocation2 + $0xa0] sm:$0xff]  ;;  %v481_v17 = vld [vmem:[#allocation2 + $0xb0] sm:$0xff] }
  0x1e   :  { %v486_v19 = vld [vmem:[#allocation2 + $0xd8] sm:$0xff]  ;;  %v1528_v6 = vpack.c.bf16 %v501_v5, %v499_v4  ;;  %v504_v7 = vld [vmem:[#allocation2 + $0x168] sm:$0xff]  ;;  %v505_v11 = vld [vmem:[#allocation2 + $0x170] sm:$0xff] }
  0x1f   :  { %v50_v24 = vadd.f32 %v49_v20, %v48_v15  ;;  %v56_v25 = vrot.slane %v55_v21, 2  ;;  %v64_v26 = vadd.f32 %v63_v22, %v62_v18  ;;  %v70_v27 = vrot.slane %v69_v23, 2  ;;  %v484_v18 = vld [vmem:[#allocation2 + $0xc8] sm:$0xff]  ;;  %v483_v22 = vld [vmem:[#allocation2 + $0xc0] sm:$0xff] }
  0x20   :  { %1497 = vmatpush1.bf16.msra.mxu0 %v1496_v2  ;;  %v1506_v15 = vpack.c.bf16 %v482_v13, %v480_v12  ;;  %v1508_v20 = vpack.c.bf16 %v481_v17, %v479_v16  ;;  %v502_v2 = vld [vmem:[#allocation2 + $0x158] sm:$0xff]  ;;  %v508_v12 = vld [vmem:[#allocation2 + $0x188] sm:$0xff]  ;;  %v507_v16 = vld [vmem:[#allocation2 + $0x180] sm:$0xff] }
  0x21   :  { %v51_v28 = vrot.slane %v50_v24, 1  ;;  %v57_v29 = vadd.f32 %v56_v25, %v55_v21  ;;  %v65_v30 = vrot.slane %v64_v26, 1  ;;  %v71_v31 = vadd.f32 %v70_v27, %v69_v23  ;;  %1499 = vmatprep.subr.bf16.mxu0 %v1498_v3  ;;  %v485_v23 = vld [vmem:[#allocation2 + $0xd0] sm:$0xff]  ;;  %v490_v25 = vld [vmem:[#allocation2 + $0xf8] sm:$0xff] }
  0x22   :  { %v1510_v21 = vpack.c.bf16 %v486_v19, %v484_v18  ;;  %v1526_v3 = vpack.c.bf16 %v502_v2, %v500_v1  ;;  %v510_v13 = vld [vmem:[#allocation2 + $0x198] sm:$0xff]  ;;  %v509_v17 = vld [vmem:[#allocation2 + $0x190] sm:$0xff]  ;;  %v512_v18 = vld [vmem:[#allocation2 + $0x1a8] sm:$0xff] }
  0x23   :  { %v52_v32 = vadd.f32 %v51_v28, %v50_v24  ;;  %v58_v33 = vrot.slane %v57_v29, 1  ;;  %v66_v34 = vadd.f32 %v65_v30, %v64_v26  ;;  %v72_v35 = vrot.slane %v71_v31, 1  ;;  %v488_v24 = vld [vmem:[#allocation2 + $0xe8] sm:$0xff]  ;;  %v487_v28 = vld [vmem:[#allocation2 + $0xe0] sm:$0xff]  ;;  %v514_v19 = vld [vmem:[#allocation2 + $0x1b8] sm:$0xff] }
  0x24   :  { %1501 = vmatpush1.bf16.msra.mxu0 %v1500_v8  ;;  %v1512_v26 = vpack.c.bf16 %v485_v23, %v483_v22  ;;  %v1514_v27 = vpack.c.bf16 %v490_v25, %v488_v24  ;;  %v492_v30 = vld [vmem:[#allocation2 + $0x108] sm:$0xff]  ;;  %v506_v8 = vld [vmem:[#allocation2 + $0x178] sm:$0xff]  ;;  %v511_v22 = vld [vmem:[#allocation2 + $0x1a0] sm:$0xff] }
  0x25   :  { %v59_v36 = vadd.f32 %v58_v33, %v57_v29  ;;  %v1890_v37 = vmul.f32 0.33333334, %v52_v32  ;;  %v73_v38 = vadd.f32 %v72_v35, %v71_v31  ;;  %v1892_v39 = vmul.f32 0.33333334, %v66_v34  ;;  %1503 = vmatprep.subr.bf16.mxu0 %v1502_v9  ;;  %v489_v29 = vld [vmem:[#allocation2 + $0xf0] sm:$0xff]  ;;  %v494_v31 = vld [vmem:[#allocation2 + $0x118] sm:$0xff] }
  0x26   :  { %v1516_v32 = vpack.c.bf16 %v489_v29, %v487_v28  ;;  %v1518_v33 = vpack.c.bf16 %v494_v31, %v492_v30  ;;  %v491_v34 = vld [vmem:[#allocation2 + $0x100] sm:$0xff]  ;;  %v493_v35 = vld [vmem:[#allocation2 + $0x110] sm:$0xff]  ;;  %v1530_v10 = vpack.c.bf16 %v506_v8, %v504_v7  ;;  %v516_v24 = vld [vmem:[#allocation2 + $0x1c8] sm:$0xff] }
  0x27   :  { %v1894_v40 = vmul.f32 0.33333334, %v59_v36  ;;  %v1896_v41 = vmul.f32 0.33333334, %v73_v38  ;;  %v84_v42 = vsel %vm83_vm1, %v1892_v39, %v1890_v37  ;;  %v496_v36 = vld [vmem:[#allocation2 + $0x128] sm:$0xff]  ;;  %v498_v38 = vld [vmem:[#allocation2 + $0x138] sm:$0xff] }
  0x28   :  { %v89_v43 = vsel %vm88_vm2, %v84_v42, 0.0  ;;  %1505 = vmatpush1.bf16.msra.mxu0 %v1504_v14  ;;  %v1520_v42 = vpack.c.bf16 %v493_v35, %v491_v34  ;;  %v503_v9 = vld [vmem:[#allocation2 + $0x160] sm:$0xff]  ;;  %v513_v23 = vld [vmem:[#allocation2 + $0x1b0] sm:$0xff]  ;;  %v518_v25 = vld [vmem:[#allocation2 + $0x1d8] sm:$0xff] }
  0x29   :  { %v85_v44 = vsel %vm83_vm1, %v1896_v41, %v1894_v40  ;;  %1507 = vmatprep.subr.bf16.mxu0 %v1506_v15  ;;  %v1532_v14 = vpack.c.bf16 %v505_v11, %v503_v9  ;;  %v1534_v15 = vpack.c.bf16 %v510_v13, %v508_v12  ;;  %v515_v28 = vld [vmem:[#allocation2 + $0x1c0] sm:$0xff]  ;;  %v517_v29 = vld [vmem:[#allocation2 + $0x1d0] sm:$0xff]  ;;  %v520_v30 = vld [vmem:[#allocation2 + $0x1e8] sm:$0xff] }
  0x2a   :  { %v90_v45 = vsel %vm88_vm2, %v85_v44, 0.0  ;;  %v522_v31 = vld [vmem:[#allocation2 + $0x1f8] sm:$0xff]  ;;  %v519_v34 = vld [vmem:[#allocation2 + $0x1e0] sm:$0xff]  ;;  %v521_v35 = vld [vmem:[#allocation2 + $0x1f0] sm:$0xff] }
  0x2b   :  { %v91_v46 = vadd.f32 %v90_v45, %v89_v43  ;;  %v1522_v43 = vpack.c.bf16 %v498_v38, %v496_v36  ;;  %v1548_v36 = vpack.c.bf16 %v521_v35, %v519_v34  ;;  %v148_v38 = vlaneseq }
  0x2c   :  { %1509 = vmatpush1.bf16.msra.mxu0 %v1508_v20  ;;  %v1536_v20 = vpack.c.bf16 %v509_v17, %v507_v16 }
  0x2d   :  { %92 = vadd.xlane.f32.xlu0 %v91_v46  ;;  %1511 = vmatprep.subr.bf16.mxu0 %v1510_v21  ;;  %v1538_v21 = vpack.c.bf16 %v514_v19, %v512_v18 }
  0x30   :  { %1513 = vmatpush1.bf16.msra.mxu0 %v1512_v26  ;;  %v1540_v26 = vpack.c.bf16 %v513_v23, %v511_v22 }
  0x31   :  { %1515 = vmatprep.subr.bf16.mxu0 %v1514_v27  ;;  %v1542_v27 = vpack.c.bf16 %v518_v25, %v516_v24 }
  0x34   :  { %1517 = vmatpush1.bf16.msra.mxu0 %v1516_v32  ;;  %v1544_v32 = vpack.c.bf16 %v517_v29, %v515_v28  ;;  %v1951_v29 = vshrl.u32 %v148_v38, 7 }
  0x35   :  { %1519 = vmatprep.subr.bf16.mxu0 %v1518_v33  ;;  %v1546_v33 = vpack.c.bf16 %v522_v31, %v520_v30  ;;  %v523_v31 = vld [vmem:[%s2346_s3] ss:$8 sm:$0x3] }
  0x36   :  { %v1954_v30 = vsub.s32 0, %v1951_v29 }
  0x38   :  { %1521 = vmatpush1.bf16.msra.mxu0 %v1520_v42  ;;  %v1920_v42 = vand.u32 127, %v148_v38 }
  0x39   :  { %1523 = vmatprep.subr.bf16.mxu0 %v1522_v43 }
  0x3a   :  { %v1923_v43 = vadd.s32 128, %v1920_v42  ;;  %vm638_vm9 = vcmp.lt.s32.totalorder %v1920_v42, 1  ;;  %vm645_vm10 = vcmp.lt.s32.totalorder %v1920_v42, 125  ;;  %vm658_vm13 = vcmp.lt.s32.totalorder %v1920_v42, 2 }
  0x3b   :  { %vm665_vm14 = vcmp.lt.s32.totalorder %v1920_v42, 126 }
  0x3c   :  { %1525 = vmatpush1.bf16.msra.mxu0 %v1524_v0 }
  0x3d   :  { %1527 = vmatprep.subr.bf16.mxu0 %v1526_v3 }
  0x40   :  { %1529 = vmatpush1.bf16.msra.mxu0 %v1528_v6 }
  0x41   :  { %1531 = vmatprep.subr.bf16.mxu0 %v1530_v10 }
  0x44   :  { %1533 = vmatpush1.bf16.msra.mxu0 %v1532_v14 }
  0x45   :  { %1535 = vmatprep.subr.bf16.mxu0 %v1534_v15 }
  0x48   :  { %1537 = vmatpush1.bf16.msra.mxu0 %v1536_v20 }
  0x49   :  { %1539 = vmatprep.subr.bf16.mxu0 %v1538_v21 }
  0x4c   :  { %1541 = vmatpush1.bf16.msra.mxu0 %v1540_v26 }
  0x4d   :  { %1543 = vmatprep.subr.bf16.mxu0 %v1542_v27 }
  0x50   :  { %1545 = vmatpush1.bf16.msra.mxu0 %v1544_v32  ;;  %v528_v32 = vrot.slane %v523_v31, %v1954_v30 }
  0x51   :  { %1547 = vmatprep.subr.bf16.mxu0 %v1546_v33  ;;  %v1961_v33 = vsub.s32 1, %v1951_v29 }
  0x54   :  { %1549 = vmatpush1.bf16.msra.mxu0 %v1548_v36  ;;  %v532_v36 = vrot.slane %v523_v31, %v1961_v33 }
  0xba   :  { %v93_v44 = vpop.xlane.xlu0 %92 }
  0xbb   :  { %v1906_v45 = vmul.f32 0.00390625, %v93_v44 }
  0xbd   :  { %v97_v46 = vrot.slane %v1906_v45, 1  ;;  %v100_v47 = vsub.f32 %v1890_v37, %v1906_v45  ;;  %v101_v48 = vsub.f32 %v1894_v40, %v1906_v45 }
  0xbf   :  { %v102_v49 = vsub.f32 %v1892_v39, %v97_v46  ;;  %v103_v50 = vsub.f32 %v1896_v41, %v97_v46  ;;  %v104_v53 = vmul.f32 %v100_v47, %v100_v47  ;;  %v105_v54 = vmul.f32 %v101_v48, %v101_v48 }
  0xc0   :  { %v152_v47 = vcvt.s32.f32 %v1923_v43  ;;  %v151_v48 = vcvt.s32.f32 %v1920_v42 }
  0xc1   :  { %v106_v51 = vmul.f32 %v102_v49, %v102_v49  ;;  %v107_v52 = vmul.f32 %v103_v50, %v103_v50 }
  0xc2   :  { %v154_v49 = vmul.f32 0.0625, %v152_v47  ;;  %v153_v50 = vmul.f32 0.0625, %v151_v48 }
  0xc3   :  { %v112_v55 = vrot.slane %v106_v51, 7  ;;  %v114_v56 = vrot.slane %v107_v52, 7 }
  0xc4   :  { %v156_v51 = vfloor.f32 %v154_v49  ;;  %v621_v49 = vand.u32 3, %v1923_v43 }
  0xc5   :  { %v113_v57 = vsel %vm83_vm1, %v112_v55, %v104_v53  ;;  %v115_v58 = vsel %vm83_vm1, %v114_v56, %v105_v54  ;;  %v155_v53 = vfloor.f32 %v153_v50  ;;  %v791_v50 = vld [vmem:[#allocation2 + $0x308] sm:$0xff] }
  0xc6   :  { %v118_v59 = vsel %vm88_vm2, %v113_v57, 0.0  ;;  %v119_v60 = vsel %vm88_vm2, %v115_v58, 0.0  ;;  %v158_v56 = vmul.f32 16.0, %v156_v51  ;;  %vm1978_vm12 = vcmp.ge.s32.totalorder %v621_v49, 1 }
  0xc7   :  { %v120_v61 = vadd.f32 %v119_v60, %v118_v59  ;;  %v157_v59 = vmul.f32 16.0, %v155_v53  ;;  %vm2002_vm0 = vcmp.ge.s32.totalorder %v621_v49, 2  ;;  %v775_v49 = vld [vmem:[#allocation2 + $0x288] sm:$0xff] }
  0xc9   :  { %121 = vadd.xlane.f32.xlu0 %v120_v61  ;;  %v160_v61 = vsub.f32 %v152_v47, %v158_v56  ;;  %v159_v1 = vsub.f32 %v151_v48, %v157_v59  ;;  %v614_v47 = vand.u32 3, %v1920_v42 }
  0xcb   :  { %vm1972_vm11 = vcmp.ge.s32.totalorder %v614_v47, 1  ;;  %vm1998_vm15 = vcmp.ge.s32.totalorder %v614_v47, 2  ;;  %v770_v47 = vld [vmem:[#allocation2 + $0x260] sm:$0xff] }
 0x156   :  { %v122_v44 = vpop.xlane.xlu0 %121 }
 0x157   :  { %v123_v46 = vmul.f32 0.003921569, %v122_v44 }
 0x159   :  { %1769 = vrsqrt.f32 %v123_v46  ;;  %vm126_vm3 = vcmp.eq.f32.partialorder %v123_v46, inf  ;;  %v129_v55 = vand.u32 2147483648, %v123_v46  ;;  %vm128_vm4 = vcmp.eq.f32.partialorder %v123_v46, 0.0 }
 0x163   :  { %v1770_v52 = vpop.eup %1769 }
 0x164   :  { %v125_v54 = vmul.f32 %v1770_v52, %v123_v46 }
 0x166   :  { %v127_v57 = vsel %vm126_vm3, %v123_v46, %v125_v54  ;;  %v793_v54 = vld [vmem:[#allocation2 + $0x318] sm:$0xff] }
 0x167   :  { %v130_v58 = vsel %vm128_vm4, %v129_v55, %v127_v57  ;;  %vm963_vm4 = vcmp.lt.s32.totalorder %v1920_v42, 114 }
 0x168   :  { %v131_v60 = vadd.f32 %v130_v58, %v1906_v45 }
 0x16a   :  { %v133_v62 = vrot.slane %v131_v60, 1  ;;  %vm137_vm5 = vcmp.gt.f32.partialorder %v1894_v40, %v131_v60  ;;  %vm136_vm6 = vcmp.gt.f32.partialorder %v1890_v37, %v131_v60 }
 0x16b   :  { %v1466_v0 = vsel %vm137_vm5, 1.0, %v1820_v63  ;;  %v1465_v2 = vsel %vm136_vm6, 1.0, %v1820_v63 }
 0x16c   :  { %vm139_vm7 = vcmp.gt.f32.partialorder %v1896_v41, %v133_v62  ;;  %vm138_vm8 = vcmp.gt.f32.partialorder %v1892_v39, %v133_v62  ;;  %v179_v4 = vmul.f32 %v1466_v0, %v156_v51  ;;  %v201_v5 = vmul.f32 %v1466_v0, %v160_v61 }
 0x16d   :  { %v1468_v3 = vsel %vm139_vm7, 1.0, %v1820_v63  ;;  %v1467_v6 = vsel %vm138_vm8, 1.0, %v1820_v63  ;;  %v178_v10 = vmul.f32 %v1465_v2, %v155_v53  ;;  %v200_v40 = vmul.f32 %v1465_v2, %v159_v1 }
 0x16e   :  { %v167_v7 = vrot.slane %v1468_v3, 7  ;;  %v165_v45 = vrot.slane %v1467_v6, 7  ;;  %v180_v8 = vmul.f32 %v1467_v6, %v155_v53  ;;  %v181_v9 = vmul.f32 %v1468_v3, %v156_v51 }
 0x16f   :  { %v202_v11 = vmul.f32 %v1467_v6, %v159_v1  ;;  %v203_v37 = vmul.f32 %v1468_v3, %v160_v61  ;;  %v1480_v1 = vld [vmem:[%s2346_s3 + $0x2] ss:$8 sm:$0x3]  ;;  %vm976_vm7 = vcmp.lt.s32.totalorder %v1920_v42, 4  ;;  %vm983_vm8 = vcmp.lt.s32.totalorder %v1920_v42, 116 }
 0x170   :  { %v168_v12 = vsel %vm83_vm1, %v167_v7, %v1466_v0  ;;  %v166_v13 = vsel %vm83_vm1, %v165_v45, %v1465_v2  ;;  %v186_v41 = vrot.slane %v180_v8, 7  ;;  %v188_v14 = vrot.slane %v181_v9, 7 }
 0x171   :  { %v172_v39 = vsel %vm88_vm2, %v168_v12, 0.0  ;;  %599 = vmatprep.mubr.f32.mxu0 %v168_v12  ;;  %v208_v15 = vrot.slane %v202_v11, 7  ;;  %v210_v16 = vrot.slane %v203_v37, 7  ;;  %v171_v17 = vsel %vm88_vm2, %v166_v13, 0.0 }
 0x172   :  { %600 = vmatmul.mubr.f32.vlgmr.msra.gmra.mrb[0].mxu0 %v166_v13  ;;  %v187_v18 = vsel %vm83_vm1, %v186_v41, %v178_v10  ;;  %v189_v19 = vsel %vm83_vm1, %v188_v14, %v179_v4  ;;  %v1938_v20 = vadd.f32 %v172_v39, %v171_v17  ;;  %v759_v14 = vld [vmem:[#allocation2 + $0x208] sm:$0xff]  ;;  %v761_v39 = vld [vmem:[#allocation2 + $0x218] sm:$0xff]  ;;  %v760_v17 = vld [vmem:[#allocation2 + $0x210] sm:$0xff] }
 0x173   :  { %v192_v21 = vsel %vm88_vm2, %v187_v18, 0.0  ;;  %v193_v22 = vsel %vm88_vm2, %v189_v19, 0.0  ;;  %v209_v23 = vsel %vm83_vm1, %v208_v15, %v200_v40  ;;  %v211_v24 = vsel %vm83_vm1, %v210_v16, %v201_v5  ;;  %v758_v15 = vld [vmem:[#allocation2 + $0x200] sm:$0xff]  ;;  %v763_v18 = vld [vmem:[#allocation2 + $0x228] sm:$0xff]  ;;  %v765_v19 = vld [vmem:[#allocation2 + $0x238] sm:$0xff] }
 0x174   :  { %v1944_v25 = vadd.f32 %v193_v22, %v192_v21  ;;  %v214_v26 = vsel %vm88_vm2, %v209_v23, 0.0  ;;  %v215_v27 = vsel %vm88_vm2, %v211_v24, 0.0  ;;  %v1550_v16 = vpack.c.bf16 %v761_v39, %v759_v14  ;;  %v762_v23 = vld [vmem:[#allocation2 + $0x220] sm:$0xff]  ;;  %v764_v24 = vld [vmem:[#allocation2 + $0x230] sm:$0xff] }
 0x175   :  { %v1948_v28 = vadd.f32 %v215_v27, %v214_v26  ;;  %v1552_v21 = vpack.c.bf16 %v760_v17, %v758_v15  ;;  %v1554_v22 = vpack.c.bf16 %v765_v19, %v763_v18  ;;  %v767_v26 = vld [vmem:[#allocation2 + $0x248] sm:$0xff]  ;;  %v769_v27 = vld [vmem:[#allocation2 + $0x258] sm:$0xff]  ;;  %v1556_v31 = vpack.c.bf16 %v764_v24, %v762_v23 }
 0x176   :  { %1551 = vmatprep.subr.bf16.mxu1 %v1550_v16  ;;  %v787_v15 = vld [vmem:[#allocation2 + $0x2e8] sm:$0xff]  ;;  %v789_v16 = vld [vmem:[#allocation2 + $0x2f8] sm:$0xff]  ;;  %vm944_vm1 = vcmp.lt.s32.totalorder %v1920_v42, 113 }
 0x177   :  { %1553 = vmatpush1.bf16.msra.mxu1 %v1552_v21  ;;  %v1578_v19 = vpack.c.bf16 %v789_v16, %v787_v15  ;;  %v786_v21 = vld [vmem:[#allocation2 + $0x2e0] sm:$0xff]  ;;  %v821_v15 = vld [vmem:[#allocation2 + $0x3f8] sm:$0xff] }
 0x178   :  { %1555 = vmatprep.subr.bf16.mxu1 %v1554_v22  ;;  %v788_v22 = vld [vmem:[#allocation2 + $0x2f0] sm:$0xff] }
 0x17b   :  { %1557 = vmatpush1.bf16.msra.mxu1 %v1556_v31  ;;  %v1582_v31 = vpack.c.bf16 %v793_v54, %v791_v50 }
 0x245   :  { %v601_v34 = vpop.f32.mrb[0].mxu0 }
 0x246   :  { %v602_v35 = vadd.f32 %v601_v34, %v528_v32  ;;  %v603_v44 = vpop.f32.mrb[1].mxu0  ;;  %v1558_v32 = vpack.c.bf16 %v769_v27, %v767_v26  ;;  %v766_v34 = vld [vmem:[#allocation2 + $0x240] sm:$0xff]  ;;  %v1580_v26 = vpack.c.bf16 %v788_v22, %v786_v21 }
 0x247   :  { %v604_v38 = vadd.f32 %v603_v44, %v532_v36  ;;  %v771_v36 = vld [vmem:[#allocation2 + $0x268] sm:$0xff]  ;;  %v773_v44 = vld [vmem:[#allocation2 + $0x278] sm:$0xff]  ;;  %v790_v27 = vld [vmem:[#allocation2 + $0x300] sm:$0xff] }
 0x248   :  { %641 = vrot.lane.b32.xlu0 %v602_v35, %s1821_s2  ;;  %634 = vrot.lane.b32.xlu1 %v602_v35, %s1822_s11 }
 0x249   :  { %1559 = vmatprep.subr.bf16.mxu1 %v1558_v32  ;;  %v792_v32 = vld [vmem:[#allocation2 + $0x310] sm:$0xff] }
 0x24c   :  { %636 = vrot.lane.b32.xlu1 %v604_v38, %s1822_s11 }
 0x250   :  { %643 = vrot.lane.b32.xlu1 %v604_v38, %s1821_s2 }
 0x2ba   :  { %v635_v46 = vpop.permute.xlu1 %634  ;;  %v642_v51 = vpop.permute.xlu0 %641 }
 0x2be   :  { %v637_v48 = vpop.permute.xlu1 %636 }
 0x2bf   :  { %v640_v53 = vsel %vm638_vm9, %v637_v48, %v635_v46  ;;  %v639_v58 = vsel %vm638_vm9, %v635_v46, %v637_v48  ;;  %v1562_v46 = vpack.c.bf16 %v773_v44, %v771_v36  ;;  %v772_v48 = vld [vmem:[#allocation2 + $0x270] sm:$0xff] }
 0x2c0   :  { %v796_v44 = vld [vmem:[#allocation2 + $0x330] sm:$0xff] }
 0x2c2   :  { %v644_v52 = vpop.permute.xlu1 %643 }
 0x2c3   :  { %v646_v55 = vsel %vm645_vm10, %v642_v51, %v644_v52  ;;  %v647_v56 = vsel %vm645_vm10, %v644_v52, %v642_v51  ;;  %v777_v51 = vld [vmem:[#allocation2 + $0x298] sm:$0xff]  ;;  %v1564_v52 = vpack.c.bf16 %v772_v48, %v770_v47 }
 0x2c4   :  { %v650_v57 = vsel %vm1972_vm11, %v640_v53, %v646_v55  ;;  %v651_v60 = vsel %vm1978_vm12, %v639_v58, %v647_v56  ;;  %v1566_v53 = vpack.c.bf16 %v777_v51, %v775_v49  ;;  %v774_v55 = vld [vmem:[#allocation2 + $0x280] sm:$0xff]  ;;  %v776_v56 = vld [vmem:[#allocation2 + $0x290] sm:$0xff]  ;;  %v779_v58 = vld [vmem:[#allocation2 + $0x2a8] sm:$0xff] }
 0x2c5   :  { %v652_v59 = vadd.f32 %v650_v57, %v602_v35  ;;  %v653_v61 = vadd.f32 %v651_v60, %v604_v38  ;;  %v1568_v57 = vpack.c.bf16 %v776_v56, %v774_v55  ;;  %v798_v49 = vld [vmem:[#allocation2 + $0x340] sm:$0xff]  ;;  %v800_v51 = vld [vmem:[#allocation2 + $0x350] sm:$0xff] }
 0x2c6   :  { %v1592_v55 = vpack.c.bf16 %v800_v51, %v798_v49  ;;  %v737_v51 = vrot.slane %v1480_v1, %v1954_v30 }
 0x2c7   :  { %654 = vrot.lane.b32.xlu1 %v652_v59, %s1823_s12 }
 0x2cb   :  { %656 = vrot.lane.b32.xlu1 %v653_v61, %s1823_s12 }
 0x2cf   :  { %661 = vrot.lane.b32.xlu1 %v652_v59, %s1824_s13 }
 0x2d3   :  { %663 = vrot.lane.b32.xlu1 %v653_v61, %s1824_s13 }
 0x339   :  { %v655_v62 = vpop.permute.xlu1 %654 }
 0x33d   :  { %v657_v63 = vpop.permute.xlu1 %656 }
 0x33e   :  { %v659_v4 = vsel %vm658_vm13, %v655_v62, %v657_v63  ;;  %v660_v5 = vsel %vm658_vm13, %v657_v63, %v655_v62  ;;  %v780_v62 = vld [vmem:[#allocation2 + $0x2b0] sm:$0xff] }
 0x341   :  { %v662_v0 = vpop.permute.xlu1 %661 }
 0x345   :  { %v664_v3 = vpop.permute.xlu1 %663 }
 0x346   :  { %v666_v6 = vsel %vm665_vm14, %v662_v0, %v664_v3  ;;  %v667_v7 = vsel %vm665_vm14, %v664_v3, %v662_v0 }
 0x347   :  { %v670_v45 = vsel %vm1998_vm15, %v660_v5, %v666_v6  ;;  %v671_v8 = vsel %vm2002_vm0, %v659_v4, %v667_v7  ;;  %v783_v4 = vld [vmem:[#allocation2 + $0x2c8] sm:$0xff]  ;;  %v785_v5 = vld [vmem:[#allocation2 + $0x2d8] sm:$0xff]  ;;  %v782_v7 = vld [vmem:[#allocation2 + $0x2c0] sm:$0xff] }
 0x348   :  { %v672_v9 = vadd.f32 %v670_v45, %v652_v59  ;;  %v673_v10 = vadd.f32 %v671_v8, %v653_v61  ;;  %v781_v59 = vld [vmem:[#allocation2 + $0x2b8] sm:$0xff]  ;;  %v778_v61 = vld [vmem:[#allocation2 + $0x2a0] sm:$0xff]  ;;  %v1574_v6 = vpack.c.bf16 %v785_v5, %v783_v4  ;;  %v784_v45 = vld [vmem:[#allocation2 + $0x2d0] sm:$0xff] }
 0x349   :  { %v1570_v60 = vpack.c.bf16 %v781_v59, %v779_v58  ;;  %v1572_v63 = vpack.c.bf16 %v780_v62, %v778_v61  ;;  %v1576_v8 = vpack.c.bf16 %v784_v45, %v782_v7  ;;  %v804_v58 = vld [vmem:[#allocation2 + $0x370] sm:$0xff]  ;;  %v807_v59 = vld [vmem:[#allocation2 + $0x388] sm:$0xff]  ;;  %v813_v4 = vld [vmem:[#allocation2 + $0x3b8] sm:$0xff] }
 0x34a   :  { %v674_v40 = vmul.f32 0.25, %v672_v9  ;;  %v675_v11 = vmul.f32 0.25, %v673_v10  ;;  %v810_v7 = vld [vmem:[#allocation2 + $0x3a0] sm:$0xff]  ;;  %v812_v45 = vld [vmem:[#allocation2 + $0x3b0] sm:$0xff] }
 0x34c   :  { %v2018_v37 = vsub.f32 %v604_v38, %v675_v11  ;;  %v2020_v12 = vsub.f32 %v602_v35, %v674_v40  ;;  %v768_v35 = vld [vmem:[#allocation2 + $0x250] sm:$0xff] }
 0x34d   :  { %v1560_v38 = vpack.c.bf16 %v768_v35, %v766_v34  ;;  %v795_v34 = vld [vmem:[#allocation2 + $0x328] sm:$0xff]  ;;  %v1584_v35 = vpack.c.bf16 %v792_v32, %v790_v27 }
 0x34e   :  { %v2024_v13 = vmul.f32 %v2018_v37, %v2018_v37  ;;  %v2028_v41 = vmul.f32 %v2020_v12, %v2020_v12 }
 0x34f   :  { %1561 = vmatpush1.bf16.msra.mxu1 %v1560_v38  ;;  %v799_v38 = vld [vmem:[#allocation2 + $0x348] sm:$0xff] }
 0x350   :  { %682 = vrot.lane.b32.xlu0 %v2024_v13, %s1822_s11  ;;  %680 = vrot.lane.b32.xlu1 %v2028_v41, %s1822_s11 }
 0x351   :  { %1563 = vmatprep.subr.bf16.mxu1 %v1562_v46  ;;  %v801_v46 = vld [vmem:[#allocation2 + $0x358] sm:$0xff] }
 0x352   :  { %v1590_v48 = vpack.c.bf16 %v801_v46, %v799_v38 }
 0x353   :  { %1565 = vmatpush1.bf16.msra.mxu1 %v1564_v52  ;;  %v803_v52 = vld [vmem:[#allocation2 + $0x368] sm:$0xff] }
 0x354   :  { %688 = vrot.lane.b32.xlu0 %v2024_v13, %s1821_s2  ;;  %686 = vrot.lane.b32.xlu1 %v2028_v41, %s1821_s2 }
 0x355   :  { %1567 = vmatprep.subr.bf16.mxu1 %v1566_v53  ;;  %v805_v53 = vld [vmem:[#allocation2 + $0x378] sm:$0xff] }
 0x356   :  { %v1594_v56 = vpack.c.bf16 %v805_v53, %v803_v52 }
 0x357   :  { %1569 = vmatpush1.bf16.msra.mxu1 %v1568_v57  ;;  %v802_v57 = vld [vmem:[#allocation2 + $0x360] sm:$0xff] }
 0x358   :  { %1571 = vmatprep.subr.bf16.mxu1 %v1570_v60  ;;  %v809_v60 = vld [vmem:[#allocation2 + $0x398] sm:$0xff]  ;;  %v1596_v61 = vpack.c.bf16 %v804_v58, %v802_v57 }
 0x359   :  { %v1598_v62 = vpack.c.bf16 %v809_v60, %v807_v59 }
 0x35b   :  { %1573 = vmatpush1.bf16.msra.mxu1 %v1572_v63  ;;  %v806_v63 = vld [vmem:[#allocation2 + $0x380] sm:$0xff] }
 0x35c   :  { %1575 = vmatprep.subr.bf16.mxu1 %v1574_v6 }
 0x35f   :  { %1577 = vmatpush1.bf16.msra.mxu1 %v1576_v8  ;;  %v815_v8 = vld [vmem:[#allocation2 + $0x3c8] sm:$0xff] }
 0x360   :  { %1579 = vmatprep.subr.bf16.mxu1 %v1578_v19  ;;  %v820_v19 = vld [vmem:[#allocation2 + $0x3f0] sm:$0xff] }
 0x363   :  { %1581 = vmatpush1.bf16.msra.mxu1 %v1580_v26 }
 0x364   :  { %1583 = vmatprep.subr.bf16.mxu1 %v1582_v31 }
 0x367   :  { %1585 = vmatpush1.bf16.msra.mxu1 %v1584_v35 }
 0x3c2   :  { %v683_v0 = vpop.permute.xlu0 %682  ;;  %v681_v3 = vpop.permute.xlu1 %680 }
 0x3c3   :  { %v684_v40 = vsel %vm638_vm9, %v681_v3, %v683_v0  ;;  %v685_v11 = vsel %vm638_vm9, %v683_v0, %v681_v3  ;;  %v808_v0 = vld [vmem:[#allocation2 + $0x390] sm:$0xff]  ;;  %v811_v3 = vld [vmem:[#allocation2 + $0x3a8] sm:$0xff] }
 0x3c4   :  { %v1600_v5 = vpack.c.bf16 %v808_v0, %v806_v63  ;;  %v1602_v6 = vpack.c.bf16 %v813_v4, %v811_v3 }
 0x3c6   :  { %v689_v9 = vpop.permute.xlu0 %688  ;;  %v687_v10 = vpop.permute.xlu1 %686 }
 0x3c7   :  { %v690_v14 = vsel %vm645_vm10, %v687_v10, %v689_v9  ;;  %v691_v39 = vsel %vm645_vm10, %v689_v9, %v687_v10  ;;  %v817_v9 = vld [vmem:[#allocation2 + $0x3d8] sm:$0xff]  ;;  %v1604_v10 = vpack.c.bf16 %v812_v45, %v810_v7 }
 0x3c8   :  { %v692_v17 = vsel %vm1972_vm11, %v685_v11, %v690_v14  ;;  %v693_v18 = vsel %vm1978_vm12, %v684_v40, %v691_v39  ;;  %v1606_v40 = vpack.c.bf16 %v817_v9, %v815_v8  ;;  %v814_v11 = vld [vmem:[#allocation2 + $0x3c0] sm:$0xff]  ;;  %v816_v14 = vld [vmem:[#allocation2 + $0x3d0] sm:$0xff]  ;;  %v819_v39 = vld [vmem:[#allocation2 + $0x3e8] sm:$0xff]  ;;  %vm996_vm12 = vcmp.lt.s32.totalorder %v1920_v42, 8 }
 0x3c9   :  { %v2051_v23 = vadd.f32 %v693_v18, %v2024_v13  ;;  %v2054_v24 = vadd.f32 %v692_v17, %v2028_v41  ;;  %v797_v13 = vld [vmem:[#allocation2 + $0x338] sm:$0xff]  ;;  %v794_v41 = vld [vmem:[#allocation2 + $0x320] sm:$0xff]  ;;  %v1608_v16 = vpack.c.bf16 %v816_v14, %v814_v11  ;;  %v1610_v17 = vpack.c.bf16 %v821_v15, %v819_v39 }
 0x3ca   :  { %v1586_v36 = vpack.c.bf16 %v797_v13, %v795_v34  ;;  %v1588_v47 = vpack.c.bf16 %v796_v44, %v794_v41  ;;  %v818_v18 = vld [vmem:[#allocation2 + $0x3e0] sm:$0xff]  ;;  %v2108_v14 = vand.u32 15, %v1920_v42  ;;  %v2111_v39 = vand.u32 15, %v1923_v43 }
 0x3cb   :  { %698 = vrot.lane.b32.xlu0 %v2051_v23, %s1823_s12  ;;  %696 = vrot.lane.b32.xlu1 %v2054_v24, %s1823_s12  ;;  %v1612_v21 = vpack.c.bf16 %v820_v19, %v818_v18 }
 0x3cc   :  { %1587 = vmatprep.subr.bf16.mxu1 %v1586_v36  ;;  %vm947_vm2 = vcmp.ge.s32.totalorder %v2108_v14, 1  ;;  %vm948_vm3 = vcmp.ge.s32.totalorder %v2111_v39, 1  ;;  %vm966_vm5 = vcmp.ge.s32.totalorder %v2108_v14, 2  ;;  %vm967_vm6 = vcmp.ge.s32.totalorder %v2111_v39, 2 }
 0x3cd   :  { %1589 = vmatpush1.bf16.msra.mxu1 %v1588_v47  ;;  %vm986_vm10 = vcmp.ge.s32.totalorder %v2108_v14, 4  ;;  %vm987_vm11 = vcmp.ge.s32.totalorder %v2111_v39, 4 }
 0x3ce   :  { %1591 = vmatprep.subr.bf16.mxu1 %v1590_v48  ;;  %v1479_v48 = vld [vmem:[%s2346_s3 + $0x1] ss:$8 sm:$0x3] }
 0x3cf   :  { %704 = vrot.lane.b32.xlu0 %v2051_v23, %s1824_s13  ;;  %702 = vrot.lane.b32.xlu1 %v2054_v24, %s1824_s13  ;;  %v724_v2 = vrot.slane %v1479_v48, %v1954_v30 }
 0x3d1   :  { %1593 = vmatpush1.bf16.msra.mxu1 %v1592_v55  ;;  %v741_v55 = vrot.slane %v1480_v1, %v1961_v33 }
 0x3d2   :  { %1595 = vmatprep.subr.bf16.mxu1 %v1594_v56 }
 0x3d5   :  { %1597 = vmatpush1.bf16.msra.mxu1 %v1596_v61 }
 0x3d6   :  { %1599 = vmatprep.subr.bf16.mxu1 %v1598_v62 }
 0x3d9   :  { %1601 = vmatpush1.bf16.msra.mxu1 %v1600_v5 }
 0x3da   :  { %1603 = vmatprep.subr.bf16.mxu1 %v1602_v6 }
 0x3dd   :  { %1605 = vmatpush1.bf16.msra.mxu1 %v1604_v10 }
 0x3de   :  { %1607 = vmatprep.subr.bf16.mxu1 %v1606_v40 }
 0x3e1   :  { %1609 = vmatpush1.bf16.msra.mxu1 %v1608_v16 }
 0x3e2   :  { %1611 = vmatprep.subr.bf16.mxu1 %v1610_v17 }
 0x3e5   :  { %1613 = vmatpush1.bf16.msra.mxu1 %v1612_v21 }
 0x43d   :  { %v699_v22 = vpop.permute.xlu0 %698  ;;  %v697_v26 = vpop.permute.xlu1 %696 }
 0x43e   :  { %v700_v27 = vsel %vm658_vm13, %v697_v26, %v699_v22  ;;  %v701_v31 = vsel %vm658_vm13, %v699_v22, %v697_v26 }
 0x441   :  { %v705_v50 = vpop.permute.xlu0 %704  ;;  %v703_v54 = vpop.permute.xlu1 %702 }
 0x442   :  { %v706_v32 = vsel %vm665_vm14, %v703_v54, %v705_v50  ;;  %v707_v34 = vsel %vm665_vm14, %v705_v50, %v703_v54  ;;  %vm1003_vm14 = vcmp.lt.s32.totalorder %v1920_v42, 120  ;;  %v1482_v42 = vld [vmem:[%s2346_s3 + $0x4] ss:$8 sm:$0x3] }
 0x443   :  { %v708_v13 = vsel %vm1998_vm15, %v701_v31, %v706_v32  ;;  %v709_v35 = vsel %vm2002_vm0, %v700_v27, %v707_v34  ;;  %vm1006_vm15 = vcmp.ge.s32.totalorder %v2108_v14, 8  ;;  %vm1007_vm0 = vcmp.ge.s32.totalorder %v2111_v39, 8  ;;  %v1483_v14 = vld [vmem:[%s2346_s3 + $0x5] ss:$8 sm:$0x3] }
 0x444   :  { %v710_v36 = vadd.f32 %v708_v13, %v2054_v24  ;;  %v711_v41 = vadd.f32 %v709_v35, %v2051_v23  ;;  %v728_v24 = vrot.slane %v1479_v48, %v1961_v33  ;;  %v1094_v39 = vrot.slane %v1482_v42, %v1954_v30 }
 0x446   :  { %v712_v44 = vmul.f32 0.25, %v710_v36  ;;  %v713_v38 = vmul.f32 0.25, %v711_v41 }
 0x448   :  { %v714_v46 = vadd.f32 1e-06, %v712_v44  ;;  %v715_v47 = vadd.f32 1e-06, %v713_v38 }
 0x44a   :  { %1771 = vrsqrt.f32 %v714_v46 }
 0x44b   :  { %1773 = vrsqrt.f32 %v715_v47 }
 0x454   :  { %v1772_v49 = vpop.eup %1771 }
 0x455   :  { %v1774_v23 = vpop.eup %1773  ;;  %v718_v52 = vmul.f32 %v1772_v49, %v2020_v12 }
 0x456   :  { %v719_v53 = vmul.f32 %v1774_v23, %v2018_v37  ;;  %v1481_v37 = vld [vmem:[%s2346_s3 + $0x3] ss:$8 sm:$0x3] }
 0x457   :  { %v731_v56 = vmul.f32 %v724_v2, %v718_v52  ;;  %v828_v7 = vrot.slane %v1481_v37, %v1954_v30  ;;  %v832_v45 = vrot.slane %v1481_v37, %v1961_v33 }
 0x458   :  { %v732_v57 = vmul.f32 %v728_v24, %v719_v53 }
 0x459   :  { %v744_v58 = vadd.f32 %v737_v51, %v731_v56 }
 0x45a   :  { %v745_v59 = vadd.f32 %v741_v55, %v732_v57 }
 0x45b   :  { %v749_v60 = vmul.f32 0.70710677, %v744_v58  ;;  %v746_v0 = vmul.f32 0.5, %v744_v58 }
 0x45c   :  { %v750_v61 = vmul.f32 0.70710677, %v745_v59  ;;  %v747_v4 = vmul.f32 0.5, %v745_v59 }
 0x45d   :  { %1775 = verf.f32 %v749_v60 }
 0x45e   :  { %1777 = verf.f32 %v750_v61 }
 0x467   :  { %v1776_v62 = vpop.eup %1775 }
 0x468   :  { %v1778_v63 = vpop.eup %1777  ;;  %v753_v3 = vadd.f32 1.0, %v1776_v62 }
 0x469   :  { %v754_v5 = vadd.f32 1.0, %v1778_v63 }
 0x46a   :  { %v755_v6 = vmul.f32 %v753_v3, %v746_v0 }
 0x46b   :  { %v756_v12 = vmul.f32 %v754_v5, %v747_v4 }
 0x46d   :  { %899 = vmatprep.mubr.f32.mxu1 %v756_v12 }
 0x46e   :  { %900 = vmatmul.mubr.f32.vlgmr.msra.gmra.mrb[0].mxu1 %v755_v6 }
 0x541   :  { %v901_v8 = vpop.f32.mrb[0].mxu1 }
 0x542   :  { %v2095_v9 = vadd.f32 %v901_v8, %v828_v7  ;;  %v903_v10 = vpop.f32.mrb[1].mxu1 }
 0x543   :  { %v2097_v40 = vadd.f32 %v903_v10, %v832_v45 }
 0x544   :  { %934 = vrot.lane.b32.xlu1 %v2095_v9, %s1822_s11 }
 0x545   :  { %936 = vrot.lane.b32.xlu0 %v2097_v40, %s1822_s11 }
 0x548   :  { %940 = vrot.lane.b32.xlu1 %v2095_v9, %s1825_s20 }
 0x549   :  { %942 = vrot.lane.b32.xlu0 %v2097_v40, %s1825_s20 }
 0x5b6   :  { %v935_v11 = vpop.permute.xlu1 %934 }
 0x5b7   :  { %v937_v15 = vpop.permute.xlu0 %936 }
 0x5b8   :  { %v938_v18 = vsel %vm638_vm9, %v935_v11, %v937_v15  ;;  %v939_v19 = vsel %vm638_vm9, %v937_v15, %v935_v11 }
 0x5ba   :  { %v941_v16 = vpop.permute.xlu1 %940 }
 0x5bb   :  { %v943_v17 = vpop.permute.xlu0 %942 }
 0x5bc   :  { %v945_v21 = vsel %vm944_vm1, %v941_v16, %v943_v17  ;;  %v946_v43 = vsel %vm944_vm1, %v943_v17, %v941_v16 }
 0x5bd   :  { %v949_v22 = vsel %vm947_vm2, %v939_v19, %v945_v21  ;;  %v950_v26 = vsel %vm948_vm3, %v938_v18, %v946_v43 }
 0x5be   :  { %v952_v50 = vadd.f32 %v950_v26, %v2097_v40  ;;  %v951_v54 = vadd.f32 %v949_v22, %v2095_v9 }
 0x5c0   :  { %955 = vrot.lane.b32.xlu0 %v952_v50, %s1823_s12  ;;  %953 = vrot.lane.b32.xlu1 %v951_v54, %s1823_s12 }
 0x5c4   :  { %961 = vrot.lane.b32.xlu0 %v952_v50, %s1826_s21  ;;  %959 = vrot.lane.b32.xlu1 %v951_v54, %s1826_s21 }
 0x632   :  { %v956_v27 = vpop.permute.xlu0 %955  ;;  %v954_v31 = vpop.permute.xlu1 %953 }
 0x633   :  { %v957_v13 = vsel %vm658_vm13, %v954_v31, %v956_v27  ;;  %v958_v35 = vsel %vm658_vm13, %v956_v27, %v954_v31 }
 0x636   :  { %v962_v32 = vpop.permute.xlu0 %961  ;;  %v960_v34 = vpop.permute.xlu1 %959 }
 0x637   :  { %v964_v36 = vsel %vm963_vm4, %v960_v34, %v962_v32  ;;  %v965_v41 = vsel %vm963_vm4, %v962_v32, %v960_v34 }
 0x638   :  { %v968_v44 = vsel %vm966_vm5, %v958_v35, %v964_v36  ;;  %v969_v38 = vsel %vm967_vm6, %v957_v13, %v965_v41 }
 0x639   :  { %v971_v46 = vadd.f32 %v969_v38, %v952_v50  ;;  %v970_v47 = vadd.f32 %v968_v44, %v951_v54 }
 0x63b   :  { %974 = vrot.lane.b32.xlu0 %v971_v46, %s1827_s22  ;;  %972 = vrot.lane.b32.xlu1 %v970_v47, %s1827_s22 }
 0x63f   :  { %981 = vrot.lane.b32.xlu0 %v971_v46, %s1828_s23  ;;  %979 = vrot.lane.b32.xlu1 %v970_v47, %s1828_s23 }
 0x6ad   :  { %v975_v48 = vpop.permute.xlu0 %974  ;;  %v973_v1 = vpop.permute.xlu1 %972 }
 0x6ae   :  { %v977_v24 = vsel %vm976_vm7, %v973_v1, %v975_v48  ;;  %v978_v23 = vsel %vm976_vm7, %v975_v48, %v973_v1  ;;  %v1130_v48 = vld [vmem:[#allocation2 + $0x418] sm:$0xff]  ;;  %v1264_v1 = vld [vmem:[#allocation2 + $0x608] sm:$0xff] }
 0x6b1   :  { %v982_v2 = vpop.permute.xlu0 %981  ;;  %v980_v49 = vpop.permute.xlu1 %979 }
 0x6b2   :  { %v984_v51 = vsel %vm983_vm8, %v980_v49, %v982_v2  ;;  %v985_v52 = vsel %vm983_vm8, %v982_v2, %v980_v49  ;;  %v1266_v49 = vld [vmem:[#allocation2 + $0x618] sm:$0xff] }
 0x6b3   :  { %v988_v53 = vsel %vm986_vm10, %v978_v23, %v984_v51  ;;  %v989_v55 = vsel %vm987_vm11, %v977_v24, %v985_v52  ;;  %v1127_v24 = vld [vmem:[#allocation2 + $0x400] sm:$0xff]  ;;  %v1129_v23 = vld [vmem:[#allocation2 + $0x410] sm:$0xff]  ;;  %v1678_v51 = vpack.c.bf16 %v1266_v49, %v1264_v1 }
 0x6b4   :  { %v991_v56 = vadd.f32 %v989_v55, %v971_v46  ;;  %v990_v57 = vadd.f32 %v988_v53, %v970_v47  ;;  %v1128_v47 = vld [vmem:[#allocation2 + $0x408] sm:$0xff]  ;;  %v1616_v52 = vpack.c.bf16 %v1129_v23, %v1127_v24  ;;  %v1263_v53 = vld [vmem:[#allocation2 + $0x600] sm:$0xff]  ;;  %v1265_v55 = vld [vmem:[#allocation2 + $0x610] sm:$0xff] }
 0x6b5   :  { %v1614_v2 = vpack.c.bf16 %v1130_v48, %v1128_v47  ;;  %1679 = vmatprep.subr.bf16.mxu1 %v1678_v51  ;;  %v1145_v49 = vld [vmem:[#allocation2 + $0x490] sm:$0xff]  ;;  %v1279_v24 = vld [vmem:[#allocation2 + $0x680] sm:$0xff] }
 0x6b6   :  { %994 = vrot.lane.b32.xlu0 %v991_v56, %s1829_s24  ;;  %992 = vrot.lane.b32.xlu1 %v990_v57, %s1829_s24  ;;  %v1281_v51 = vld [vmem:[#allocation2 + $0x690] sm:$0xff] }
 0x6b7   :  { %1615 = vmatprep.subr.bf16.mxu0 %v1614_v2  ;;  %v1143_v2 = vld [vmem:[#allocation2 + $0x480] sm:$0xff] }
 0x6b8   :  { %1617 = vmatpush1.bf16.msra.mxu0 %v1616_v52  ;;  %v1632_v23 = vpack.c.bf16 %v1145_v49, %v1143_v2  ;;  %v1696_v52 = vpack.c.bf16 %v1281_v51, %v1279_v24  ;;  %v1291_v2 = vld [vmem:[#allocation2 + $0x6e0] sm:$0xff]  ;;  %v1293_v49 = vld [vmem:[#allocation2 + $0x6f0] sm:$0xff]  ;;  %v1162_v51 = vld [vmem:[#allocation2 + $0x518] sm:$0xff] }
 0x6b9   :  { %v1708_v24 = vpack.c.bf16 %v1293_v49, %v1291_v2  ;;  %v1312_v2 = vld [vmem:[#allocation2 + $0x788] sm:$0xff]  ;;  %v1314_v49 = vld [vmem:[#allocation2 + $0x798] sm:$0xff] }
 0x6ba   :  { %1001 = vrot.lane.b32.xlu0 %v991_v56, %s1830_s25  ;;  %999 = vrot.lane.b32.xlu1 %v990_v57, %s1830_s25 }
 0x728   :  { %v995_v58 = vpop.permute.xlu0 %994  ;;  %v993_v59 = vpop.permute.xlu1 %992 }
 0x729   :  { %v997_v62 = vsel %vm996_vm12, %v993_v59, %v995_v58  ;;  %v998_v63 = vsel %vm996_vm12, %v995_v58, %v993_v59  ;;  %v1134_v58 = vld [vmem:[#allocation2 + $0x438] sm:$0xff]  ;;  %v1268_v59 = vld [vmem:[#allocation2 + $0x628] sm:$0xff] }
 0x72c   :  { %v1002_v60 = vpop.permute.xlu0 %1001  ;;  %v1000_v61 = vpop.permute.xlu1 %999 }
 0x72d   :  { %v1004_v0 = vsel %vm1003_vm14, %v1000_v61, %v1002_v60  ;;  %v1005_v3 = vsel %vm1003_vm14, %v1002_v60, %v1000_v61  ;;  %v1270_v60 = vld [vmem:[#allocation2 + $0x638] sm:$0xff] }
 0x72e   :  { %v1008_v4 = vsel %vm1006_vm15, %v998_v63, %v1004_v0  ;;  %v1009_v5 = vsel %vm1007_vm0, %v997_v62, %v1005_v3  ;;  %v1682_v62 = vpack.c.bf16 %v1270_v60, %v1268_v59  ;;  %v1131_v63 = vld [vmem:[#allocation2 + $0x420] sm:$0xff]  ;;  %v1133_v0 = vld [vmem:[#allocation2 + $0x430] sm:$0xff] }
 0x72f   :  { %v1010_v6 = vadd.f32 %v1008_v4, %v990_v57  ;;  %v1011_v12 = vadd.f32 %v1009_v5, %v991_v56  ;;  %v1132_v56 = vld [vmem:[#allocation2 + $0x428] sm:$0xff]  ;;  %v1680_v57 = vpack.c.bf16 %v1265_v55, %v1263_v53  ;;  %v1267_v3 = vld [vmem:[#allocation2 + $0x620] sm:$0xff]  ;;  %v1620_v4 = vpack.c.bf16 %v1133_v0, %v1131_v63  ;;  %v1269_v5 = vld [vmem:[#allocation2 + $0x630] sm:$0xff] }
 0x730   :  { %v1618_v61 = vpack.c.bf16 %v1134_v58, %v1132_v56  ;;  %v1148_v53 = vld [vmem:[#allocation2 + $0x4a8] sm:$0xff]  ;;  %v1150_v55 = vld [vmem:[#allocation2 + $0x4b8] sm:$0xff]  ;;  %v1147_v60 = vld [vmem:[#allocation2 + $0x4a0] sm:$0xff] }
 0x731   :  { %v1012_v37 = vmul.f32 0.0625, %v1010_v6  ;;  %v1013_v7 = vmul.f32 0.0625, %v1011_v12  ;;  %1681 = vmatpush1.bf16.msra.mxu1 %v1680_v57  ;;  %v1136_v6 = vld [vmem:[#allocation2 + $0x448] sm:$0xff]  ;;  %v1138_v12 = vld [vmem:[#allocation2 + $0x458] sm:$0xff]  ;;  %v1634_v57 = vpack.c.bf16 %v1150_v55, %v1148_v53  ;;  %v1285_v0 = vld [vmem:[#allocation2 + $0x6b0] sm:$0xff] }
 0x732   :  { %1619 = vmatprep.subr.bf16.mxu0 %v1618_v61  ;;  %1683 = vmatprep.subr.bf16.mxu1 %v1682_v62  ;;  %v1284_v56 = vld [vmem:[#allocation2 + $0x6a8] sm:$0xff]  ;;  %v1286_v58 = vld [vmem:[#allocation2 + $0x6b8] sm:$0xff]  ;;  %v1149_v61 = vld [vmem:[#allocation2 + $0x4b0] sm:$0xff] }
 0x733   :  { %v2190_v45 = vsub.f32 %v2097_v40, %v1013_v7  ;;  %v2193_v8 = vsub.f32 %v2095_v9, %v1012_v37  ;;  %v1684_v37 = vpack.c.bf16 %v1269_v5, %v1267_v3  ;;  %v1622_v7 = vpack.c.bf16 %v1138_v12, %v1136_v6  ;;  %1621 = vmatpush1.bf16.msra.mxu0 %v1620_v4  ;;  %v1283_v62 = vld [vmem:[#allocation2 + $0x6a0] sm:$0xff]  ;;  %v1152_v6 = vld [vmem:[#allocation2 + $0x4c8] sm:$0xff]  ;;  %v1154_v12 = vld [vmem:[#allocation2 + $0x4d8] sm:$0xff] }
 0x734   :  { %v1698_v59 = vpack.c.bf16 %v1286_v58, %v1284_v56  ;;  %v1636_v63 = vpack.c.bf16 %v1149_v61, %v1147_v60  ;;  %v1700_v5 = vpack.c.bf16 %v1285_v0, %v1283_v62  ;;  %v1159_v53 = vld [vmem:[#allocation2 + $0x500] sm:$0xff]  ;;  %v1161_v55 = vld [vmem:[#allocation2 + $0x510] sm:$0xff]  ;;  %v1164_v60 = vld [vmem:[#allocation2 + $0x528] sm:$0xff] }
 0x735   :  { %v1017_v10 = vmul.f32 %v2190_v45, %v2190_v45  ;;  %v1016_v11 = vmul.f32 %v2193_v8, %v2193_v8  ;;  %1685 = vmatpush1.bf16.msra.mxu1 %v1684_v37  ;;  %1623 = vmatprep.subr.bf16.mxu0 %v1622_v7  ;;  %v1288_v37 = vld [vmem:[#allocation2 + $0x6c8] sm:$0xff]  ;;  %v1638_v7 = vpack.c.bf16 %v1154_v12, %v1152_v6  ;;  %v1295_v58 = vld [vmem:[#allocation2 + $0x700] sm:$0xff]  ;;  %v1166_v62 = vld [vmem:[#allocation2 + $0x538] sm:$0xff] }
 0x736   :  { %v1302_v0 = vld [vmem:[#allocation2 + $0x738] sm:$0xff]  ;;  %v1165_v6 = vld [vmem:[#allocation2 + $0x530] sm:$0xff]  ;;  %v1299_v12 = vld [vmem:[#allocation2 + $0x720] sm:$0xff] }
 0x737   :  { %1020 = vrot.lane.b32.xlu0 %v1017_v10, %s1822_s11  ;;  %1018 = vrot.lane.b32.xlu1 %v1016_v11, %s1822_s11 }
 0x73b   :  { %1026 = vrot.lane.b32.xlu0 %v1017_v10, %s1825_s20  ;;  %1024 = vrot.lane.b32.xlu1 %v1016_v11, %s1825_s20 }
 0x7a9   :  { %v1021_v15 = vpop.permute.xlu0 %1020  ;;  %v1019_v40 = vpop.permute.xlu1 %1018 }
 0x7aa   :  { %v1022_v9 = vsel %vm638_vm9, %v1019_v40, %v1021_v15  ;;  %v1023_v18 = vsel %vm638_vm9, %v1021_v15, %v1019_v40  ;;  %v1135_v15 = vld [vmem:[#allocation2 + $0x440] sm:$0xff] }
 0x7ad   :  { %v1027_v16 = vpop.permute.xlu0 %1026  ;;  %v1025_v17 = vpop.permute.xlu1 %1024 }
 0x7ae   :  { %v1028_v19 = vsel %vm944_vm1, %v1025_v17, %v1027_v16  ;;  %v1029_v21 = vsel %vm944_vm1, %v1027_v16, %v1025_v17  ;;  %v1137_v16 = vld [vmem:[#allocation2 + $0x450] sm:$0xff]  ;;  %v1271_v17 = vld [vmem:[#allocation2 + $0x640] sm:$0xff] }
 0x7af   :  { %v1030_v43 = vsel %vm947_vm2, %v1023_v18, %v1028_v19  ;;  %v1031_v22 = vsel %vm948_vm3, %v1022_v9, %v1029_v21  ;;  %v1273_v9 = vld [vmem:[#allocation2 + $0x650] sm:$0xff]  ;;  %v1624_v18 = vpack.c.bf16 %v1137_v16, %v1135_v15  ;;  %v1140_v19 = vld [vmem:[#allocation2 + $0x468] sm:$0xff]  ;;  %v1142_v21 = vld [vmem:[#allocation2 + $0x478] sm:$0xff] }
 0x7b0   :  { %v1033_v26 = vadd.f32 %v1031_v22, %v1017_v10  ;;  %v1032_v50 = vadd.f32 %v1030_v43, %v1016_v11  ;;  %v1272_v10 = vld [vmem:[#allocation2 + $0x648] sm:$0xff]  ;;  %v1274_v11 = vld [vmem:[#allocation2 + $0x658] sm:$0xff]  ;;  %v1688_v22 = vpack.c.bf16 %v1273_v9, %v1271_v17  ;;  %v1153_v15 = vld [vmem:[#allocation2 + $0x4d0] sm:$0xff] }
 0x7b1   :  { %v1686_v40 = vpack.c.bf16 %v1274_v11, %v1272_v10  ;;  %v1276_v43 = vld [vmem:[#allocation2 + $0x668] sm:$0xff]  ;;  %1625 = vmatpush1.bf16.msra.mxu0 %v1624_v18  ;;  %v1290_v10 = vld [vmem:[#allocation2 + $0x6d8] sm:$0xff]  ;;  %v1151_v11 = vld [vmem:[#allocation2 + $0x4c0] sm:$0xff] }
 0x7b2   :  { %1036 = vrot.lane.b32.xlu0 %v1033_v26, %s1823_s12  ;;  %1034 = vrot.lane.b32.xlu1 %v1032_v50, %s1823_s12  ;;  %v1640_v16 = vpack.c.bf16 %v1153_v15, %v1151_v11  ;;  %v1287_v17 = vld [vmem:[#allocation2 + $0x6c0] sm:$0xff]  ;;  %v1289_v9 = vld [vmem:[#allocation2 + $0x6d0] sm:$0xff]  ;;  %v1170_v11 = vld [vmem:[#allocation2 + $0x558] sm:$0xff] }
 0x7b3   :  { %1687 = vmatprep.subr.bf16.mxu1 %v1686_v40  ;;  %v1702_v40 = vpack.c.bf16 %v1290_v10, %v1288_v37  ;;  %v1168_v10 = vld [vmem:[#allocation2 + $0x548] sm:$0xff] }
 0x7b4   :  { %1689 = vmatpush1.bf16.msra.mxu1 %v1688_v22 }
 0x7b6   :  { %1042 = vrot.lane.b32.xlu0 %v1033_v26, %s1826_s21  ;;  %1040 = vrot.lane.b32.xlu1 %v1032_v50, %s1826_s21 }
 0x824   :  { %v1037_v54 = vpop.permute.xlu0 %1036  ;;  %v1035_v27 = vpop.permute.xlu1 %1034 }
 0x825   :  { %v1038_v34 = vsel %vm658_vm13, %v1035_v27, %v1037_v54  ;;  %v1039_v13 = vsel %vm658_vm13, %v1037_v54, %v1035_v27  ;;  %v1139_v54 = vld [vmem:[#allocation2 + $0x460] sm:$0xff]  ;;  %v1141_v27 = vld [vmem:[#allocation2 + $0x470] sm:$0xff] }
 0x828   :  { %v1043_v31 = vpop.permute.xlu0 %1042  ;;  %v1041_v32 = vpop.permute.xlu1 %1040 }
 0x829   :  { %v1044_v35 = vsel %vm963_vm4, %v1041_v32, %v1043_v31  ;;  %v1045_v36 = vsel %vm963_vm4, %v1043_v31, %v1041_v32  ;;  %v1275_v32 = vld [vmem:[#allocation2 + $0x660] sm:$0xff] }
 0x82a   :  { %v1046_v41 = vsel %vm966_vm5, %v1039_v13, %v1044_v35  ;;  %v1047_v44 = vsel %vm967_vm6, %v1038_v34, %v1045_v36  ;;  %v1277_v34 = vld [vmem:[#allocation2 + $0x670] sm:$0xff]  ;;  %v1144_v13 = vld [vmem:[#allocation2 + $0x488] sm:$0xff]  ;;  %v1146_v35 = vld [vmem:[#allocation2 + $0x498] sm:$0xff] }
 0x82b   :  { %v2231_v38 = vadd.f32 %v1047_v44, %v1033_v26  ;;  %v2233_v46 = vadd.f32 %v1046_v41, %v1032_v50  ;;  %v1626_v26 = vpack.c.bf16 %v1142_v21, %v1140_v19  ;;  %v1278_v50 = vld [vmem:[#allocation2 + $0x678] sm:$0xff]  ;;  %v1280_v36 = vld [vmem:[#allocation2 + $0x688] sm:$0xff]  ;;  %v1628_v44 = vpack.c.bf16 %v1141_v27, %v1139_v54 }
 0x82c   :  { %v1690_v31 = vpack.c.bf16 %v1278_v50, %v1276_v43  ;;  %v1282_v41 = vld [vmem:[#allocation2 + $0x698] sm:$0xff]  ;;  %v1692_v47 = vpack.c.bf16 %v1277_v34, %v1275_v32  ;;  %v1630_v48 = vpack.c.bf16 %v1146_v35, %v1144_v13  ;;  %v1704_v43 = vpack.c.bf16 %v1289_v9, %v1287_v17  ;;  %v1156_v54 = vld [vmem:[#allocation2 + $0x4e8] sm:$0xff]  ;;  %v1167_v9 = vld [vmem:[#allocation2 + $0x540] sm:$0xff] }
 0x82d   :  { %1052 = vrot.lane.b32.xlu0 %v2231_v38, %s1827_s22  ;;  %1050 = vrot.lane.b32.xlu1 %v2233_v46, %s1827_s22  ;;  %v1694_v1 = vpack.c.bf16 %v1282_v41, %v1280_v36  ;;  %v1158_v27 = vld [vmem:[#allocation2 + $0x4f8] sm:$0xff]  ;;  %v1155_v36 = vld [vmem:[#allocation2 + $0x4e0] sm:$0xff]  ;;  %v1157_v41 = vld [vmem:[#allocation2 + $0x4f0] sm:$0xff] }
 0x82e   :  { %1627 = vmatprep.subr.bf16.mxu0 %v1626_v26  ;;  %1691 = vmatprep.subr.bf16.mxu1 %v1690_v31  ;;  %v1292_v31 = vld [vmem:[#allocation2 + $0x6e8] sm:$0xff]  ;;  %v1642_v13 = vpack.c.bf16 %v1158_v27, %v1156_v54  ;;  %v1294_v35 = vld [vmem:[#allocation2 + $0x6f8] sm:$0xff] }
 0x82f   :  { %1629 = vmatpush1.bf16.msra.mxu0 %v1628_v44  ;;  %1693 = vmatpush1.bf16.msra.mxu1 %v1692_v47  ;;  %v1306_v17 = vld [vmem:[#allocation2 + $0x758] sm:$0xff] }
 0x830   :  { %1631 = vmatprep.subr.bf16.mxu0 %v1630_v48  ;;  %1695 = vmatprep.subr.bf16.mxu1 %v1694_v1  ;;  %v1706_v48 = vpack.c.bf16 %v1294_v35, %v1292_v31  ;;  %v1644_v1 = vpack.c.bf16 %v1157_v41, %v1155_v36  ;;  %v1310_v27 = vld [vmem:[#allocation2 + $0x778] sm:$0xff]  ;;  %v1307_v35 = vld [vmem:[#allocation2 + $0x760] sm:$0xff]  ;;  %v1309_v41 = vld [vmem:[#allocation2 + $0x770] sm:$0xff] }
 0x831   :  { %1058 = vrot.lane.b32.xlu0 %v2231_v38, %s1828_s23  ;;  %1056 = vrot.lane.b32.xlu1 %v2233_v46, %s1828_s23 }
 0x833   :  { %1633 = vmatpush1.bf16.msra.mxu0 %v1632_v23  ;;  %1697 = vmatpush1.bf16.msra.mxu1 %v1696_v52  ;;  %v1160_v23 = vld [vmem:[#allocation2 + $0x508] sm:$0xff] }
 0x834   :  { %1635 = vmatprep.subr.bf16.mxu0 %v1634_v57  ;;  %1699 = vmatprep.subr.bf16.mxu1 %v1698_v59  ;;  %v1296_v52 = vld [vmem:[#allocation2 + $0x708] sm:$0xff]  ;;  %v1648_v57 = vpack.c.bf16 %v1161_v55, %v1159_v53  ;;  %v1297_v59 = vld [vmem:[#allocation2 + $0x710] sm:$0xff]  ;;  %v1726_v53 = vpack.c.bf16 %v1314_v49, %v1312_v2 }
 0x835   :  { %v1712_v61 = vpack.c.bf16 %v1297_v59, %v1295_v58  ;;  %v1313_v55 = vld [vmem:[#allocation2 + $0x790] sm:$0xff]  ;;  %v1316_v58 = vld [vmem:[#allocation2 + $0x7a8] sm:$0xff]  ;;  %v1318_v59 = vld [vmem:[#allocation2 + $0x7b8] sm:$0xff] }
 0x837   :  { %1637 = vmatpush1.bf16.msra.mxu0 %v1636_v63  ;;  %1701 = vmatpush1.bf16.msra.mxu1 %v1700_v5  ;;  %v1300_v63 = vld [vmem:[#allocation2 + $0x728] sm:$0xff]  ;;  %v1163_v5 = vld [vmem:[#allocation2 + $0x520] sm:$0xff] }
 0x838   :  { %1639 = vmatprep.subr.bf16.mxu0 %v1638_v7  ;;  %1703 = vmatprep.subr.bf16.mxu1 %v1702_v40  ;;  %v1652_v37 = vpack.c.bf16 %v1165_v6, %v1163_v5  ;;  %v1301_v7 = vld [vmem:[#allocation2 + $0x730] sm:$0xff]  ;;  %v1654_v40 = vpack.c.bf16 %v1170_v11, %v1168_v10  ;;  %v1184_v6 = vld [vmem:[#allocation2 + $0x5c8] sm:$0xff] }
 0x839   :  { %v1716_v15 = vpack.c.bf16 %v1301_v7, %v1299_v12  ;;  %v1317_v5 = vld [vmem:[#allocation2 + $0x7b0] sm:$0xff]  ;;  %v1186_v12 = vld [vmem:[#allocation2 + $0x5d8] sm:$0xff] }
 0x83a   :  { %v1322_v7 = vld [vmem:[#allocation2 + $0x7d8] sm:$0xff] }
 0x83b   :  { %1641 = vmatpush1.bf16.msra.mxu0 %v1640_v16  ;;  %1705 = vmatpush1.bf16.msra.mxu1 %v1704_v43  ;;  %v1304_v16 = vld [vmem:[#allocation2 + $0x748] sm:$0xff]  ;;  %v1305_v43 = vld [vmem:[#allocation2 + $0x750] sm:$0xff] }
 0x83c   :  { %1643 = vmatprep.subr.bf16.mxu0 %v1642_v13  ;;  %1707 = vmatprep.subr.bf16.mxu1 %v1706_v48  ;;  %v1173_v13 = vld [vmem:[#allocation2 + $0x570] sm:$0xff]  ;;  %v1176_v48 = vld [vmem:[#allocation2 + $0x588] sm:$0xff] }
 0x83f   :  { %1645 = vmatpush1.bf16.msra.mxu0 %v1644_v1  ;;  %1709 = vmatpush1.bf16.msra.mxu1 %v1708_v24  ;;  %v1178_v1 = vld [vmem:[#allocation2 + $0x598] sm:$0xff] }
 0x89f   :  { %v1053_v3 = vpop.permute.xlu0 %1052  ;;  %v1051_v4 = vpop.permute.xlu1 %1050 }
 0x8a0   :  { %v1054_v18 = vsel %vm976_vm7, %v1051_v4, %v1053_v3  ;;  %v1055_v22 = vsel %vm976_vm7, %v1053_v3, %v1051_v4  ;;  %v1650_v3 = vpack.c.bf16 %v1166_v62, %v1164_v60  ;;  %v1714_v4 = vpack.c.bf16 %v1302_v0, %v1300_v63  ;;  %v1179_v63 = vld [vmem:[#allocation2 + $0x5a0] sm:$0xff]  ;;  %v1181_v0 = vld [vmem:[#allocation2 + $0x5b0] sm:$0xff] }
 0x8a1   :  { %v1668_v10 = vpack.c.bf16 %v1181_v0, %v1179_v63 }
 0x8a3   :  { %v1059_v19 = vpop.permute.xlu0 %1058  ;;  %v1057_v21 = vpop.permute.xlu1 %1056 }
 0x8a4   :  { %v1060_v26 = vsel %vm983_vm8, %v1057_v21, %v1059_v19  ;;  %v1061_v50 = vsel %vm983_vm8, %v1059_v19, %v1057_v21  ;;  %v1169_v19 = vld [vmem:[#allocation2 + $0x550] sm:$0xff]  ;;  %v1303_v21 = vld [vmem:[#allocation2 + $0x740] sm:$0xff] }
 0x8a5   :  { %v1062_v32 = vsel %vm986_vm10, %v1055_v22, %v1060_v26  ;;  %v1063_v34 = vsel %vm987_vm11, %v1054_v18, %v1061_v50  ;;  %v1718_v18 = vpack.c.bf16 %v1306_v17, %v1304_v16  ;;  %v1172_v22 = vld [vmem:[#allocation2 + $0x568] sm:$0xff]  ;;  %v1174_v26 = vld [vmem:[#allocation2 + $0x578] sm:$0xff]  ;;  %v1656_v54 = vpack.c.bf16 %v1169_v19, %v1167_v9  ;;  %v1185_v16 = vld [vmem:[#allocation2 + $0x5d0] sm:$0xff] }
 0x8a6   :  { %v2256_v44 = vadd.f32 %v1063_v34, %v2231_v38  ;;  %v2259_v47 = vadd.f32 %v1062_v32, %v2233_v46  ;;  %v1646_v38 = vpack.c.bf16 %v1162_v51, %v1160_v23  ;;  %v1298_v46 = vld [vmem:[#allocation2 + $0x718] sm:$0xff]  ;;  %v1308_v50 = vld [vmem:[#allocation2 + $0x768] sm:$0xff]  ;;  %v1720_v31 = vpack.c.bf16 %v1305_v43, %v1303_v21  ;;  %v1171_v34 = vld [vmem:[#allocation2 + $0x560] sm:$0xff] }
 0x8a7   :  { %v1710_v56 = vpack.c.bf16 %v1298_v46, %v1296_v52  ;;  %v1658_v32 = vpack.c.bf16 %v1174_v26, %v1172_v22  ;;  %v1722_v36 = vpack.c.bf16 %v1310_v27, %v1308_v50  ;;  %v1660_v24 = vpack.c.bf16 %v1173_v13, %v1171_v34  ;;  %v1175_v52 = vld [vmem:[#allocation2 + $0x580] sm:$0xff]  ;;  %v1188_v19 = vld [vmem:[#allocation2 + $0x5e8] sm:$0xff]  ;;  %v1190_v21 = vld [vmem:[#allocation2 + $0x5f8] sm:$0xff] }
 0x8a8   :  { %1068 = vrot.lane.b32.xlu0 %v2256_v44, %s1829_s24  ;;  %1066 = vrot.lane.b32.xlu1 %v2259_v47, %s1829_s24  ;;  %v1724_v23 = vpack.c.bf16 %v1309_v41, %v1307_v35  ;;  %v1662_v51 = vpack.c.bf16 %v1178_v1, %v1176_v48  ;;  %v1311_v46 = vld [vmem:[#allocation2 + $0x780] sm:$0xff]  ;;  %v1324_v43 = vld [vmem:[#allocation2 + $0x7e8] sm:$0xff]  ;;  %v1326_v22 = vld [vmem:[#allocation2 + $0x7f8] sm:$0xff] }
 0x8a9   :  { %1647 = vmatprep.subr.bf16.mxu0 %v1646_v38  ;;  %1711 = vmatprep.subr.bf16.mxu1 %v1710_v56  ;;  %v1177_v38 = vld [vmem:[#allocation2 + $0x590] sm:$0xff]  ;;  %v1180_v56 = vld [vmem:[#allocation2 + $0x5a8] sm:$0xff]  ;;  %v1319_v17 = vld [vmem:[#allocation2 + $0x7c0] sm:$0xff] }
 0x8aa   :  { %1649 = vmatpush1.bf16.msra.mxu0 %v1648_v57  ;;  %1713 = vmatpush1.bf16.msra.mxu1 %v1712_v61  ;;  %v1182_v57 = vld [vmem:[#allocation2 + $0x5b8] sm:$0xff]  ;;  %v1664_v60 = vpack.c.bf16 %v1177_v38, %v1175_v52  ;;  %v1728_v61 = vpack.c.bf16 %v1313_v55, %v1311_v46  ;;  %v1187_v27 = vld [vmem:[#allocation2 + $0x5e0] sm:$0xff]  ;;  %v1325_v13 = vld [vmem:[#allocation2 + $0x7f0] sm:$0xff] }
 0x8ab   :  { %1651 = vmatprep.subr.bf16.mxu0 %v1650_v3  ;;  %1715 = vmatprep.subr.bf16.mxu1 %v1714_v4  ;;  %v1666_v62 = vpack.c.bf16 %v1182_v57, %v1180_v56  ;;  %v1315_v3 = vld [vmem:[#allocation2 + $0x7a0] sm:$0xff]  ;;  %v1730_v4 = vpack.c.bf16 %v1318_v59, %v1316_v58  ;;  %v1107_v57 = vrot.slane %v1483_v14, %v1954_v30 }
 0x8ac   :  { %1074 = vrot.lane.b32.xlu0 %v2256_v44, %s1830_s25  ;;  %1072 = vrot.lane.b32.xlu1 %v2259_v47, %s1830_s25  ;;  %v1732_v11 = vpack.c.bf16 %v1317_v5, %v1315_v3  ;;  %v1323_v34 = vld [vmem:[#allocation2 + $0x7e0] sm:$0xff] }
 0x8ae   :  { %1653 = vmatpush1.bf16.msra.mxu0 %v1652_v37  ;;  %1717 = vmatpush1.bf16.msra.mxu1 %v1716_v15  ;;  %v1320_v37 = vld [vmem:[#allocation2 + $0x7c8] sm:$0xff]  ;;  %v1670_v15 = vpack.c.bf16 %v1186_v12, %v1184_v6 }
 0x8af   :  { %1655 = vmatprep.subr.bf16.mxu0 %v1654_v40  ;;  %1719 = vmatprep.subr.bf16.mxu1 %v1718_v18  ;;  %v1183_v40 = vld [vmem:[#allocation2 + $0x5c0] sm:$0xff]  ;;  %v1734_v9 = vpack.c.bf16 %v1322_v7, %v1320_v37  ;;  %v1321_v18 = vld [vmem:[#allocation2 + $0x7d0] sm:$0xff] }
 0x8b0   :  { %v1672_v26 = vpack.c.bf16 %v1185_v16, %v1183_v40  ;;  %v1736_v50 = vpack.c.bf16 %v1321_v18, %v1319_v17 }
 0x8b2   :  { %1657 = vmatpush1.bf16.msra.mxu0 %v1656_v54  ;;  %1721 = vmatpush1.bf16.msra.mxu1 %v1720_v31  ;;  %v1674_v54 = vpack.c.bf16 %v1190_v21, %v1188_v19  ;;  %v1189_v31 = vld [vmem:[#allocation2 + $0x5f0] sm:$0xff] }
 0x8b3   :  { %1659 = vmatprep.subr.bf16.mxu0 %v1658_v32  ;;  %1723 = vmatprep.subr.bf16.mxu1 %v1722_v36  ;;  %v1738_v32 = vpack.c.bf16 %v1326_v22, %v1324_v43  ;;  %v1676_v35 = vpack.c.bf16 %v1189_v31, %v1187_v27  ;;  %v1740_v36 = vpack.c.bf16 %v1325_v13, %v1323_v34 }
 0x8b6   :  { %1661 = vmatpush1.bf16.msra.mxu0 %v1660_v24  ;;  %1725 = vmatpush1.bf16.msra.mxu1 %v1724_v23 }
 0x8b7   :  { %1663 = vmatprep.subr.bf16.mxu0 %v1662_v51  ;;  %1727 = vmatprep.subr.bf16.mxu1 %v1726_v53 }
 0x8ba   :  { %1665 = vmatpush1.bf16.msra.mxu0 %v1664_v60  ;;  %1729 = vmatpush1.bf16.msra.mxu1 %v1728_v61  ;;  %v1111_v60 = vrot.slane %v1483_v14, %v1961_v33 }
 0x8bb   :  { %1667 = vmatprep.subr.bf16.mxu0 %v1666_v62  ;;  %1731 = vmatprep.subr.bf16.mxu1 %v1730_v4 }
 0x8be   :  { %1669 = vmatpush1.bf16.msra.mxu0 %v1668_v10  ;;  %1733 = vmatpush1.bf16.msra.mxu1 %v1732_v11 }
 0x8bf   :  { %1671 = vmatprep.subr.bf16.mxu0 %v1670_v15  ;;  %1735 = vmatprep.subr.bf16.mxu1 %v1734_v9 }
 0x8c2   :  { %1673 = vmatpush1.bf16.msra.mxu0 %v1672_v26  ;;  %1737 = vmatpush1.bf16.msra.mxu1 %v1736_v50  ;;  %v230_v50 = vld [vmem:[%s2346_s3 + $0x7] ss:$0 sm:$0xff] }
 0x8c3   :  { %1675 = vmatprep.subr.bf16.mxu0 %v1674_v54  ;;  %1739 = vmatprep.subr.bf16.mxu1 %v1738_v32 }
 0x8c6   :  { %1677 = vmatpush1.bf16.msra.mxu0 %v1676_v35  ;;  %1741 = vmatpush1.bf16.msra.mxu1 %v1740_v36 }
 0x8cb   :  { %195 = vadd.xlane.f32.xlu0 %v1944_v25 }
 0x8cf   :  { %217 = vadd.xlane.f32.xlu0 %v1948_v28 }
 0x8d0   :  { %174 = vadd.xlane.f32.xlu1 %v1938_v20 }
 0x91a   :  { %v1069_v41 = vpop.permute.xlu0 %1068  ;;  %v1067_v48 = vpop.permute.xlu1 %1066 }
 0x91b   :  { %v1070_v49 = vsel %vm996_vm12, %v1067_v48, %v1069_v41  ;;  %v1071_v24 = vsel %vm996_vm12, %v1069_v41, %v1067_v48 }
 0x91e   :  { %v1075_v1 = vpop.permute.xlu0 %1074  ;;  %v1073_v2 = vpop.permute.xlu1 %1072 }
 0x91f   :  { %v1076_v23 = vsel %vm1003_vm14, %v1073_v2, %v1075_v1  ;;  %v1077_v25 = vsel %vm1003_vm14, %v1075_v1, %v1073_v2 }
 0x920   :  { %v1078_v28 = vsel %vm1006_vm15, %v1071_v24, %v1076_v23  ;;  %v1079_v20 = vsel %vm1007_vm0, %v1070_v49, %v1077_v25 }
 0x921   :  { %v1080_v51 = vadd.f32 %v1078_v28, %v2259_v47  ;;  %v1081_v52 = vadd.f32 %v1079_v20, %v2256_v44  ;;  %v1098_v47 = vrot.slane %v1482_v42, %v1961_v33 }
 0x923   :  { %v1082_v38 = vmul.f32 0.0625, %v1080_v51  ;;  %v1083_v46 = vmul.f32 0.0625, %v1081_v52 }
 0x925   :  { %v1084_v53 = vadd.f32 1e-06, %v1082_v38  ;;  %v1085_v55 = vadd.f32 1e-06, %v1083_v46  ;;  %v1833_v46 = vmov 2102212464  }
 0x927   :  { %1779 = vrsqrt.f32 %v1084_v53 }
 0x928   :  { %1781 = vrsqrt.f32 %v1085_v55  ;;  %v1834_v55 = vmov 920167782  }
 0x931   :  { %v1780_v56 = vpop.eup %1779 }
 0x932   :  { %v1782_v44 = vpop.eup %1781  ;;  %v1088_v58 = vmul.f32 %v1780_v56, %v2193_v8  ;;  %v1835_v56 = vmov 1326507024  }
 0x933   :  { %v1089_v59 = vmul.f32 %v1782_v44, %v2190_v45  ;;  %v1836_v44 = vmov 683565275  }
 0x934   :  { %v1101_v61 = vmul.f32 %v1094_v39, %v1088_v58  ;;  %v1837_v58 = vmov 2475754826  }
 0x935   :  { %v1102_v62 = vmul.f32 %v1098_v47, %v1089_v59 }
 0x936   :  { %v1114_v63 = vadd.f32 %v1107_v57, %v1101_v61  ;;  %v1838_v61 = vmov 2131351028  }
 0x937   :  { %v1115_v0 = vadd.f32 %v1111_v60, %v1102_v62 }
 0x938   :  { %v1118_v3 = vmul.f32 0.70710677, %v1114_v63  ;;  %v1116_v12 = vmul.f32 0.5, %v1114_v63 }
 0x939   :  { %v1119_v4 = vmul.f32 0.70710677, %v1115_v0  ;;  %v1117_v7 = vmul.f32 0.5, %v1115_v0 }
 0x93a   :  { %1783 = verf.f32 %v1118_v3 }
 0x93b   :  { %1785 = verf.f32 %v1119_v4 }
 0x944   :  { %v1784_v5 = vpop.eup %1783 }
 0x945   :  { %v1786_v6 = vpop.eup %1785  ;;  %v1122_v37 = vadd.f32 1.0, %v1784_v5 }
 0x946   :  { %v1123_v10 = vadd.f32 1.0, %v1786_v6 }
 0x947   :  { %v1124_v11 = vmul.f32 %v1122_v37, %v1116_v12 }
 0x948   :  { %v1125_v8 = vmul.f32 %v1123_v10, %v1117_v7 }
 0x94a   :  { %1255 = vmatprep.mubr.f32.mxu0 %v1125_v8  ;;  %1391 = vmatprep.mubr.f32.mxu1 %v1125_v8 }
 0x94b   :  { %1256 = vmatmul.mubr.f32.vlgmr.msra.gmra.mrb[2].mxu0 %v1124_v11  ;;  %1392 = vmatmul.mubr.f32.vlgmr.msra.gmra.mrb[2].mxu1 %v1124_v11 }
 0x958   :  { %v196_v40 = vpop.xlane.xlu0 %195 }
 0x95c   :  { %v218_v17 = vpop.xlane.xlu0 %217 }
 0x95d   :  { %v175_v45 = vpop.xlane.xlu1 %174 }
 0x95e   :  { %v176_v15 = vmax.f32 %v175_v45, 1.0  ;;  %vm177_vm9 = vcmp.gt.f32.partialorder %v175_v45, 0.5 }
 0x960   :  { %1787 = vrcp.f32 %v176_v15 }
 0x96a   :  { %v1788_v16 = vpop.eup %1787 }
 0x96b   :  { %v198_v9 = vmul.f32 %v1788_v16, %v196_v40  ;;  %v219_v18 = vmul.f32 %v1788_v16, %v218_v17 }
 0x96d   :  { %v199_v19 = vsel %vm177_vm9, %v198_v9, 8.0  ;;  %v220_v21 = vsel %vm177_vm9, %v219_v18, 8.0 }
 0x96e   :  { %v226_v43 = vadd.f32 0.5, %v199_v19  ;;  %v221_v31 = vadd.f32 0.5, %v220_v21 }
 0x970   :  { %v227_v22 = vmul.f32 0.0625, %v226_v43  ;;  %v223_v32 = vmul.f32 0.0625, %v221_v31 }
 0x972   :  { %v228_v26 = vmul.f32 2.0, %v227_v22  ;;  %v224_v34 = vmul.f32 2.0, %v223_v32 }
 0x974   :  { %v1470_v54 = vadd.f32 -1.0, %v228_v26  ;;  %v1469_v13 = vadd.f32 -1.0, %v224_v34 }
 0x976   :  { %v232_v27 = vmul.f32 %v1470_v54, %v230_v50  ;;  %v231_v35 = vmul.f32 %v1469_v13, %v230_v50 }
 0x978   :  { %234 = vrot.lane.b32.xlu1 %v232_v27, %s1831_s7 }
 0x97c   :  { %453 = vrot.lane.b32.xlu1 %v230_v50, %s1832_s8 }
 0x9ea   :  { %v235_v36 = vpop.permute.xlu1 %234 }
 0x9eb   :  { %v237_v41 = vadd.f32 %v235_v36, %v231_v35 }
 0x9ed   :  { %v2301_v48 = vmul.f32 6.2831855, %v237_v41  ;;  %v1411_v41 = vsub.s32 2, %v1951_v29 }
 0x9ef   :  { %v242_v1 = vand.u32 2139095040, %v2301_v48  ;;  %v239_v2 = vand.u32 2147483647, %v2301_v48  ;;  %vm241_vm7 = vcmp.lt.s32.totalorder %v2301_v48, 0  ;;  %vm331_vm9 = vweird.f32 %v2301_v48 }
 0x9f1   :  { %v243_v49 = vshrl.u32 %v242_v1, 23  ;;  %v246_v23 = vand.u32 8388607, %v239_v2  ;;  %vm240_vm8 = vcmp.le.f32.partialorder %v239_v2, 0.7853982 }
 0x9f3   :  { %v1471_v24 = vadd.s32 4294967169, %v243_v49  ;;  %v247_v20 = vor.u32 8388608, %v246_v23  ;;  %v1484_v49 = vld [vmem:[%s2346_s3 + $0x6] ss:$8 sm:$0xf] }
 0x9f5   :  { %v249_v25 = vadd.s32 1, %v1471_v24  ;;  %v287_v14 = vshll.u32 %v247_v20, 8  ;;  %v1415_v24 = vsub.s32 3, %v1951_v29 }
 0x9f7   :  { %vm250_vm13 = vcmp.gt.s32.totalorder %v249_v25, 0 }
 0x9f8   :  { %v251_v28 = vsel %vm250_vm13, %v249_v25, 0  ;;  %v1404_v25 = vrot.slane %v1484_v49, %v1954_v30  ;;  %vm450_vm13 = vcmask 130048  }
 0x9f9   :  { %v253_v51 = vand.u32 31, %v251_v28  ;;  %v252_v52 = vshrl.u32 %v251_v28, 5  ;;  %v1412_v28 = vrot.slane %v1484_v49, %v1411_v41 }
 0x9fb   :  { %v254_v38 = vsub.s32 32, %v253_v51  ;;  %v265_v53 = vshll.u32 %v1833_v46, %v253_v51  ;;  %v268_v42 = vshll.u32 %v1834_v55, %v253_v51  ;;  %v256_v57 = vshll.u32 %v1836_v44, %v253_v51 }
 0x9fc   :  { %v259_v60 = vshll.u32 %v1837_v58, %v253_v51  ;;  %v262_v63 = vshll.u32 %v1838_v61, %v253_v51  ;;  %vm274_vm1 = vcmp.lt.s32.totalorder %v252_v52, 4  ;;  %vm271_vm2 = vcmp.lt.s32.totalorder %v252_v52, 1 }
 0x9fd   :  { %v266_v39 = vshrl.u32 %v1834_v55, %v254_v38  ;;  %v269_v47 = vshrl.u32 %v1835_v56, %v254_v38  ;;  %v257_v59 = vshrl.u32 %v1837_v58, %v254_v38  ;;  %v260_v62 = vshrl.u32 %v1838_v61, %v254_v38 }
 0x9fe   :  { %v263_v0 = vshrl.u32 %v1833_v46, %v254_v38  ;;  %v255_v6 = vshrl.u32 %v1836_v44, %v254_v38  ;;  %vm272_vm3 = vcmp.lt.s32.totalorder %v252_v52, 2  ;;  %vm273_vm4 = vcmp.lt.s32.totalorder %v252_v52, 3 }
 0x9ff   :  { %v267_v3 = vor.u32 %v266_v39, %v265_v53  ;;  %v270_v4 = vor.u32 %v269_v47, %v268_v42  ;;  %v258_v5 = vor.u32 %v257_v59, %v256_v57  ;;  %v261_v12 = vor.u32 %v260_v62, %v259_v60 }
 0xa00   :  { %v264_v37 = vor.u32 %v263_v0, %v262_v63  ;;  %v1408_v51 = vrot.slane %v1484_v49, %v1961_v33  ;;  %v1416_v52 = vrot.slane %v1484_v49, %v1415_v24 }
 0xa01   :  { %v280_v7 = vsel %vm274_vm1, %v267_v3, 920167782  ;;  %v284_v10 = vsel %vm274_vm1, %v270_v4, 1326507024  ;;  %v279_v8 = vsel %vm271_vm2, %v258_v5, %v261_v12  ;;  %v275_v40 = vsel %vm271_vm2, %v255_v6, %v258_v5 }
 0xa02   :  { %v276_v11 = vsel %vm274_vm1, %v264_v37, 2102212464  ;;  %v281_v45 = vsel %vm273_vm4, %v264_v37, %v280_v7  ;;  %v283_v15 = vsel %vm271_vm2, %v261_v12, %v264_v37  ;;  %v285_v9 = vsel %vm273_vm4, %v267_v3, %v284_v10 }
 0xa03   :  { %v277_v16 = vsel %vm273_vm4, %v261_v12, %v276_v11  ;;  %v282_v17 = vsel %vm272_vm3, %v279_v8, %v281_v45  ;;  %v286_v18 = vsel %vm272_vm3, %v283_v15, %v285_v9  ;;  %vm457_vm1 = vcmask 261120  }
 0xa04   :  { %v2307_v19 = vmul.u32.u64.low %v287_v14, %v282_v17  ;;  %v2308_v21 = vmul.u32.u64.high %v287_v14, %v282_v17, %v2307_v19  ;;  %v2310_v43 = vmul.u32.u64.low %v287_v14, %v286_v18  ;;  %v2311_v22 = vmul.u32.u64.high %v287_v14, %v286_v18, %v2310_v43 }
 0xa05   :  { %v278_v26 = vsel %vm272_vm3, %v275_v40, %v277_v16  ;;  %vm1425_vm2 = vcmask 523264  }
 0xa06   :  { %v297_v50 = vadd.s32 1, %v2308_v21  ;;  %v294_v54 = vmul.u32 %v287_v14, %v278_v26  ;;  %vm296_vm5 = vc.u32 %v2311_v22, %v2307_v19  ;;  %v295_v56 = vadd.s32 %v2307_v19, %v2311_v22 }
 0xa08   :  { %v298_v27 = vsel %vm296_vm5, %v297_v50, %v2308_v21  ;;  %v1839_v50 = vmov 1983009808  }
 0xa09   :  { %v299_v31 = vadd.s32 %v298_v27, %v294_v54  ;;  %v1435_v54 = vunpack.c.l.s4 %v1839_v50  ;;  %v454_v27 = vpop.permute.xlu1 %453 }
 0xa0b   :  { %v300_v32 = vadd.s32 536870912, %v299_v31 }
 0xa0d   :  { %v301_v34 = vshrl.u32 %v300_v32, 30 }
 0xa0f   :  { %v302_v13 = vshll.u32 %v301_v34, 30  ;;  %v325_v5 = vsub.s32 4, %v301_v34 }
 0xa11   :  { %v303_v35 = vsub.s32 %v299_v31, %v302_v13  ;;  %v326_v37 = vsel %vm241_vm7, %v325_v5, %v301_v34  ;;  %v1436_v31 = vunpack.c.0.s8 %v1435_v54 }
 0xa12   :  { %v328_v10 = vsel %vm240_vm8, 0, %v326_v37 }
 0xa13   :  { %v305_v36 = vsub.s32 0, %v303_v35  ;;  %v332_v11 = vadd.s32 3, %v328_v10  ;;  %v436_v45 = vand.u32 3, %v328_v10 }
 0xa15   :  { %v1472_v1 = vmin.u32 %v305_v36, %v303_v35  ;;  %v333_v8 = vand.u32 3, %v332_v11  ;;  %vm441_vm11 = vcmp.eq.s32.totalorder %v436_v45, 2  ;;  %vm438_vm14 = vcmp.eq.s32.totalorder %v436_v45, 0 }
 0xa16   :  { %vm437_vm0 = vcmp.lt.s32.totalorder %v436_v45, 2 }
 0xa17   :  { %v307_v23 = vclz %v1472_v1  ;;  %vm338_vm10 = vcmp.eq.s32.totalorder %v333_v8, 2  ;;  %vm335_vm12 = vcmp.eq.s32.totalorder %v333_v8, 0  ;;  %vm334_vm15 = vcmp.lt.s32.totalorder %v333_v8, 2 }
 0xa19   :  { %v1473_v20 = vadd.s32 4294967294, %v307_v23 }
 0xa1b   :  { %vm1474_vm6 = vcmp.lt.s32.totalorder %v1473_v20, 0 }
 0xa1c   :  { %v310_v53 = vsel %vm1474_vm6, 0, %v1473_v20 }
 0xa1d   :  { %v311_v47 = vsub.s32 32, %v310_v53  ;;  %v315_v57 = vsub.s32 4294967266, %v310_v53  ;;  %v312_v59 = vshll.u32 %v303_v35, %v310_v53  ;;  %v1439_v35 = vsub.s32 %v1436_v31, %v1951_v29 }
 0xa1e   :  { %v1257_v38 = vpop.f32.mrb[2].mxu0  ;;  %v1393_v46 = vpop.f32.mrb[2].mxu1 }
 0xa1f   :  { %v2323_v55 = vadd.f32 %v1404_v25, %v1257_v38  ;;  %v2325_v42 = vadd.f32 %v1412_v28, %v1393_v46  ;;  %v1259_v14 = vpop.f32.mrb[3].mxu0  ;;  %v1395_v39 = vpop.f32.mrb[3].mxu1  ;;  %v313_v58 = vshrl.u32 %v295_v56, %v311_v47  ;;  %v316_v60 = vadd.s32 127, %v315_v57 }
 0xa20   :  { %v1422_v44 = vadd.f32 %v1408_v51, %v1259_v14  ;;  %v1424_v30 = vadd.f32 %v1416_v52, %v1395_v39 }
 0xa21   :  { %v314_v61 = vor.u32 %v313_v58, %v312_v59  ;;  %v317_v62 = vshll.u32 %v316_v60, 23 }
 0xa22   :  { %v1433_v33 = vcombine.low %v1422_v44, %v2325_v42  ;;  %1485 = vst.sshfl [vmem:[%s2347_s4 + $0x8] sm:$0x3 pattern:$0x76325410] %v1424_v30 }
 0xa23   :  { %v318_v63 = vor.u32 4788187, %v317_v62  ;;  %v321_v3 = vcvt.s32.f32 %v314_v61 }
 0xa24   :  { %v1447_v1 = vrot.slane %v1433_v33, %v1439_v35 }
 0xa25   :  { %v319_v0 = vand.u32 2147483647, %v318_v63 }
 0xa27   :  { %v322_v4 = vmul.f32 %v321_v3, %v319_v0 }
 0xa29   :  { %v323_v6 = vxor.u32 2147483648, %v322_v4 }
 0xa2b   :  { %v324_v12 = vsel %vm241_vm7, %v323_v6, %v322_v4 }
 0xa2c   :  { %v327_v7 = vsel %vm240_vm8, %v2301_v48, %v324_v12 }
 0xa2d   :  { %1789 = vcosq.f32 %v327_v7 }
 0xa2e   :  { %1791 = vsinq.f32 %v327_v7 }
 0xa37   :  { %v1790_v15 = vpop.eup %1789 }
 0xa38   :  { %v1792_v40 = vpop.eup %1791  ;;  %v339_v16 = vxor.u32 2147483648, %v1790_v15 }
 0xa39   :  { %v336_v17 = vxor.u32 2147483648, %v1792_v40 }
 0xa3a   :  { %v443_v9 = vsel %vm441_vm11, %v339_v16, %v1792_v40  ;;  %v340_v2 = vsel %vm338_vm10, %v339_v16, %v1792_v40 }
 0xa3b   :  { %v440_v18 = vsel %vm438_vm14, %v1790_v15, %v336_v17  ;;  %v337_v19 = vsel %vm335_vm12, %v1790_v15, %v336_v17 }
 0xa3c   :  { %v444_v21 = vsel %vm437_vm0, %v440_v18, %v443_v9  ;;  %v341_v43 = vsel %vm334_vm15, %v337_v19, %v340_v2 }
 0xa3d   :  { %v445_v22 = vsel %vm331_vm9, nan, %v444_v21  ;;  %v342_v26 = vsel %vm331_vm9, nan, %v341_v43 }
 0xa3e   :  { %447 = vrot.lane.b32.xlu0 %v445_v22, %s1819_s26 }
 0xab0   :  { %v448_v32 = vpop.permute.xlu0 %447 }
 0xab1   :  { %v451_v34 = vsel %vm450_vm13, %v342_v26, %v448_v32 }
 0xab2   :  { %v456_v13 = vadd.f32 %v454_v27, %v451_v34 }
 0xab4   :  { %v458_v36 = vsel %vm457_vm1, %v456_v13, %v454_v27 }
 0xab5   :  { %v1426_v48 = vsel %vm1425_vm2, %v458_v36, 0.0 }
 0xab6   :  { %v1432_v41 = vcombine.low %v1426_v48, %v2323_v55 }
 0xab8   :  { %v1440_v49 = vrot.slane %v1432_v41, %v1439_v35 }
 0xaba   :  { %v1448_v24 = vcombine.low %v1440_v49, %v1447_v1 }
 0xabc   :  { %1458 = vst [vmem:[%s2347_s4] sm:$0xff] %v1448_v24 }
 0xabd   :  { %1464 = vsyncpa [#allocation3], 1 }

</bundles_post_ra>
